<compile_context>
chip_gen: v5e
topology: v5e:2x2
jax: 0.10.0
libtpu: 0.0.40
codegen_flags: <defaults>
</compile_context>

<pallas_src>
import jax
import jax.numpy as jnp
from jax.experimental import pallas as pl
from jax.experimental.pallas import tpu as pltpu


def skfusion_kernel(x1_ref, x2_ref, w1a_ref, w1b_ref, w2_ref, o_ref):
    # x1_ref/x2_ref: (Bb, C, HW)
    # w1a/w1b: (C, d)  -- first 1x1 conv, split per input, 1/HW pre-folded
    # w2:      (d, 2C) -- second 1x1 conv, pre-transposed (lane-dense N=2C)
    # o:       (Bb, C, HW)
    x1 = x1_ref[...]
    x2 = x2_ref[...]
    C = x1.shape[1]

    # Global average pool over the spatial (lane) axis.  The 1/HW scale is
    # folded into w1a/w1b, so a plain sum suffices here.
    pooled1 = jnp.sum(x1, axis=-1)                                   # (Bb, C)
    pooled2 = jnp.sum(x2, axis=-1)                                   # (Bb, C)

    # First 1x1 conv + ReLU (split form == [pooled1|pooled2] @ w1.T, no concat).
    hidden = (jnp.dot(pooled1, w1a_ref[...], preferred_element_type=jnp.float32)
              + jnp.dot(pooled2, w1b_ref[...], preferred_element_type=jnp.float32))
    hidden = jnp.maximum(hidden, 0.0)                                # (Bb, d)

    # Second 1x1 conv as ONE lane-dense matmul: (Bb, d) @ (d, 2C) -> (Bb, 2C).
    attn = jnp.dot(hidden, w2_ref[...],
                   preferred_element_type=jnp.float32)               # (Bb, 2C)
    attn1 = attn[:, :C]
    attn2 = attn[:, C:]

    # Softmax over n_inputs=2 is exactly sigmoid(attn1 - attn2); exact divide.
    a1 = 1.0 / (1.0 + jnp.exp(attn2 - attn1))                        # (Bb, C)
    a2 = 1.0 - a1
    a1 = a1[:, :, None]                                              # (Bb, C, 1)
    a2 = a2[:, :, None]

    # Weighted fusion; per-channel weights broadcast over the HW lanes.
    o_ref[...] = x1 * a1 + x2 * a2


def _tpu_vmem_and_cores():
    """Physical VMEM per core and a TensorCore-count heuristic (v7x = 2)."""
    try:
        vmem = int(pltpu.get_tpu_info().vmem_capacity_bytes)
    except Exception:  # no TPU info available -> conservative v5e/v6e defaults
        vmem = 128 << 20
    n_cores = 2 if vmem <= (64 << 20) else 1
    return vmem, n_cores


def _pick_block_b(B, C, HW, bytes_per_elem, vmem_cap, n_cores):
    """Images per grid step: ~8 MiB of x1+x2 per step, VMEM- and core-aware."""
    per_image = 2 * C * HW * bytes_per_elem           # x1 + x2 for one image
    # Double-buffered VMEM footprint of (x1 + x2 + out) is ~3x the combined
    # input block; keep that well under physical VMEM (v7x: 64 MiB/TC).
    budget = (int(0.35 * vmem_cap)) // 3
    target = min(8 << 20, max(per_image, budget))
    bb = max(1, min(B, target // per_image))
    if n_cores >= 2 and B >= 2 and B % 2 == 0:
        # Two TensorCores: keep an even number of equal-sized grid steps so
        # the "parallel" batch axis shards evenly across both cores.
        half = B // 2
        bb = min(bb, half)
        while half % bb != 0:
            bb -= 1
    else:
        # Single core: the grid is a serial loop; take the biggest divisor.
        while B % bb != 0:
            bb -= 1
    return bb
    # TODO(synk): for awkward (e.g. prime) batch sizes this degrades to bb=1;
    # a cdiv grid with a masked tail block would keep blocks large.


def sk_fusion(x1, x2, w1, w2, *, block_b=None):
    """x1, x2: (B, C, H, W) f32.  w1: (d, 2C), w2: (2C, d)  (1x1 conv weights)."""
    B, C, H, W = x1.shape
    HW = H * W
    d = w1.shape[0]
    bpe = jnp.dtype(x1.dtype).itemsize

    x1f = x1.reshape(B, C, HW)
    x2f = x2.reshape(B, C, HW)

    # Split + pre-transpose the tiny 1x1-conv weights (lane-dense matmuls,
    # no in-kernel channel slicing for layer 1) and fold 1/HW into layer 1.
    inv_hw = 1.0 / HW
    w1a_t = (w1[:, :C] * inv_hw).T.astype(jnp.float32)   # (C, d)
    w1b_t = (w1[:, C:] * inv_hw).T.astype(jnp.float32)   # (C, d)
    w2_t = w2.T.astype(jnp.float32)                      # (d, 2C)

    vmem_cap, n_cores = _tpu_vmem_and_cores()
    if block_b is None:
        block_b = _pick_block_b(B, C, HW, bpe, vmem_cap, n_cores)
    grid = (B // block_b,)

    # Scoped-VMEM limit: double-buffered x1/x2/out blocks + weights + slack.
    block_bytes = block_b * C * HW * bpe
    weight_bytes = (2 * C * d + d * 2 * C) * 4
    vmem_needed = 6 * block_bytes + 4 * weight_bytes + (4 << 20)
    vmem_limit = int(min(max(vmem_needed, 32 << 20), int(0.9 * vmem_cap)))

    # Advisory cost: HBM-bandwidth dominated (read x1, x2; write out).
    n_elems = B * C * HW
    cost = pl.CostEstimate(
        flops=5 * n_elems + 8 * B * C * d,
        transcendentals=B * C,
        bytes_accessed=3 * n_elems * bpe + 2 * weight_bytes,
    )

    out = pl.pallas_call(
        skfusion_kernel,
        out_shape=jax.ShapeDtypeStruct((B, C, HW), x1.dtype),
        grid=grid,
        in_specs=[
            pl.BlockSpec((block_b, C, HW), lambda b: (b, 0, 0)),
            pl.BlockSpec((block_b, C, HW), lambda b: (b, 0, 0)),
            pl.BlockSpec((C, d), lambda b: (0, 0)),
            pl.BlockSpec((C, d), lambda b: (0, 0)),
            pl.BlockSpec((d, 2 * C), lambda b: (0, 0)),
        ],
        out_specs=pl.BlockSpec((block_b, C, HW), lambda b: (b, 0, 0)),
        compiler_params=pltpu.CompilerParams(
            dimension_semantics=("parallel",),
            vmem_limit_bytes=vmem_limit),
        cost_estimate=cost,
    )(x1f, x2f, w1a_t, w1b_t, w2_t)
    return out.reshape(B, C, H, W)


def sk_fusion_ref(x1, x2, w1, w2):
    """Pure-JAX reference mirroring the PyTorch forward."""
    B, C, H, W = x1.shape
    x = jnp.concatenate([x1, x2], axis=1)                     # (B, 2C, H, W)
    pooled = jnp.mean(x, axis=(2, 3))                         # (B, 2C)
    hidden = jnp.maximum(pooled @ w1.T, 0.0)                  # (B, d)
    attn = hidden @ w2.T                                      # (B, 2C)
    attn = jax.nn.softmax(attn.reshape(B, 2, C), axis=1)      # (B, 2, C)
    feats = x.reshape(B, 2, C, H, W)
    return jnp.sum(feats * attn[:, :, :, None, None], axis=1)


if __name__ == "__main__":
    # Shapes from the PyTorch spec: dim=64, inputs (2, 64, 32, 32), reduction=8.
    B, dim, H, W = 2, 64, 32, 32
    C = dim
    d = max(int(2 * dim / 8), 4)          # = 16

    key = jax.random.PRNGKey(0)
    k1, k2, k3, k4 = jax.random.split(key, 4)
    x1 = jax.random.uniform(k1, (B, C, H, W), dtype=jnp.float32)
    x2 = jax.random.uniform(k2, (B, C, H, W), dtype=jnp.float32)
    # Conv2d(2C, d, 1, bias=False).weight -> (d, 2C); Conv2d(d, 2C, 1) -> (2C, d).
    w1 = jax.random.normal(k3, (d, 2 * dim), dtype=jnp.float32) * 0.1
    w2 = jax.random.normal(k4, (2 * dim, d), dtype=jnp.float32) * 0.1

    out = jax.block_until_ready(sk_fusion(x1, x2, w1, w2))
    ref = sk_fusion_ref(x1, x2, w1, w2)

    assert out.shape == (B, C, H, W)
    # Exact 2-way softmax (sigmoid form) -> tight tolerance.
    assert jnp.allclose(out, ref, atol=1e-4, rtol=1e-4), "mismatch vs reference"

    print("KERNEL_OK")
</pallas_src>

<mosaic_0001>
module attributes {stable_mosaic.version = 11 : i64} {
  func.func @skfusion_kernel(%arg0: i32, %arg1: memref<2x64x1024xf32, #tpu.memory_space<vmem>>, %arg2: memref<2x64x1024xf32, #tpu.memory_space<vmem>>, %arg3: memref<64x16xf32, #tpu.memory_space<vmem>>, %arg4: memref<64x16xf32, #tpu.memory_space<vmem>>, %arg5: memref<16x128xf32, #tpu.memory_space<vmem>>, %arg6: memref<2x64x1024xf32, #tpu.memory_space<vmem>>) attributes {dimension_semantics = [#tpu.dimension_semantics<parallel>], iteration_bounds = array<i64: 1>, scalar_prefetch = 0 : i64, scratch_operands = 0 : i64, tpu.core_type = #tpu.core_type<tc>, window_params = [{transform_indices = @transform_0, window_bounds = array<i64: 2, 64, 1024>}, {transform_indices = @transform_1, window_bounds = array<i64: 2, 64, 1024>}, {pipeline_mode = #tpu.pipeline_mode<synchronous>, transform_indices = @transform_2, window_bounds = array<i64: 64, 16>}, {pipeline_mode = #tpu.pipeline_mode<synchronous>, transform_indices = @transform_3, window_bounds = array<i64: 64, 16>}, {pipeline_mode = #tpu.pipeline_mode<synchronous>, transform_indices = @transform_4, window_bounds = array<i64: 16, 128>}, {transform_indices = @transform_5, window_bounds = array<i64: 2, 64, 1024>}]} {
    %c0 = arith.constant 0 : index
    %c0_0 = arith.constant 0 : index
    %c0_1 = arith.constant 0 : index
    %0 = vector.load %arg1[%c0, %c0_0, %c0_1] : memref<2x64x1024xf32, #tpu.memory_space<vmem>>, vector<2x64x1024xf32>
    %c0_2 = arith.constant 0 : index
    %c0_3 = arith.constant 0 : index
    %c0_4 = arith.constant 0 : index
    %1 = vector.load %arg2[%c0_2, %c0_3, %c0_4] : memref<2x64x1024xf32, #tpu.memory_space<vmem>>, vector<2x64x1024xf32>
    %cst = arith.constant dense<0.000000e+00> : vector<2x64xf32>
    %2 = vector.multi_reduction <add>, %0, %cst [2] : vector<2x64x1024xf32> to vector<2x64xf32>
    %cst_5 = arith.constant dense<0.000000e+00> : vector<2x64xf32>
    %3 = vector.multi_reduction <add>, %1, %cst_5 [2] : vector<2x64x1024xf32> to vector<2x64xf32>
    %c0_6 = arith.constant 0 : index
    %c0_7 = arith.constant 0 : index
    %4 = vector.load %arg3[%c0_6, %c0_7] : memref<64x16xf32, #tpu.memory_space<vmem>>, vector<64x16xf32>
    %cst_8 = arith.constant dense<0.000000e+00> : vector<2x16xf32>
    %5 = tpu.matmul %2, %4, %cst_8 {dimension_numbers = #tpu.dot_dimension_numbers<[1], [0], [0], [1], [0, 0, 1, 1], [], []>} : vector<2x64xf32>, vector<64x16xf32>, vector<2x16xf32> -> vector<2x16xf32>
    %c0_9 = arith.constant 0 : index
    %c0_10 = arith.constant 0 : index
    %6 = vector.load %arg4[%c0_9, %c0_10] : memref<64x16xf32, #tpu.memory_space<vmem>>, vector<64x16xf32>
    %cst_11 = arith.constant dense<0.000000e+00> : vector<2x16xf32>
    %7 = tpu.matmul %3, %6, %cst_11 {dimension_numbers = #tpu.dot_dimension_numbers<[1], [0], [0], [1], [0, 0, 1, 1], [], []>} : vector<2x64xf32>, vector<64x16xf32>, vector<2x16xf32> -> vector<2x16xf32>
    %8 = arith.addf %5, %7 : vector<2x16xf32>
    %cst_12 = arith.constant 0.000000e+00 : f32
    %9 = vector.broadcast %cst_12 : f32 to vector<2x16xf32>
    %10 = arith.maximumf %8, %9 : vector<2x16xf32>
    %c0_13 = arith.constant 0 : index
    %c0_14 = arith.constant 0 : index
    %11 = vector.load %arg5[%c0_13, %c0_14] : memref<16x128xf32, #tpu.memory_space<vmem>>, vector<16x128xf32>
    %cst_15 = arith.constant dense<0.000000e+00> : vector<2x128xf32>
    %12 = tpu.matmul %10, %11, %cst_15 {dimension_numbers = #tpu.dot_dimension_numbers<[1], [0], [0], [1], [0, 0, 1, 1], [], []>} : vector<2x16xf32>, vector<16x128xf32>, vector<2x128xf32> -> vector<2x128xf32>
    %13 = vector.extract_strided_slice %12 {offsets = [0, 0], sizes = [2, 64], strides = [1, 1]} : vector<2x128xf32> to vector<2x64xf32>
    %14 = vector.extract_strided_slice %12 {offsets = [0, 64], sizes = [2, 64], strides = [1, 1]} : vector<2x128xf32> to vector<2x64xf32>
    %15 = arith.subf %14, %13 : vector<2x64xf32>
    %16 = math.exp %15 : vector<2x64xf32>
    %cst_16 = arith.constant 1.000000e+00 : f32
    %17 = vector.broadcast %cst_16 : f32 to vector<2x64xf32>
    %18 = arith.addf %17, %16 : vector<2x64xf32>
    %cst_17 = arith.constant 1.000000e+00 : f32
    %19 = vector.broadcast %cst_17 : f32 to vector<2x64xf32>
    %20 = arith.divf %19, %18 : vector<2x64xf32>
    %cst_18 = arith.constant 1.000000e+00 : f32
    %21 = vector.broadcast %cst_18 : f32 to vector<2x64xf32>
    %22 = arith.subf %21, %20 : vector<2x64xf32>
    %23 = vector.shape_cast %20 : vector<2x64xf32> to vector<2x64x1xf32>
    %24 = vector.shape_cast %22 : vector<2x64xf32> to vector<2x64x1xf32>
    %25 = vector.broadcast %23 : vector<2x64x1xf32> to vector<2x64x1024xf32>
    %26 = arith.mulf %0, %25 : vector<2x64x1024xf32>
    %27 = vector.broadcast %24 : vector<2x64x1xf32> to vector<2x64x1024xf32>
    %28 = arith.mulf %1, %27 : vector<2x64x1024xf32>
    %29 = arith.addf %26, %28 : vector<2x64x1024xf32>
    %c0_19 = arith.constant 0 : index
    %c0_20 = arith.constant 0 : index
    %c0_21 = arith.constant 0 : index
    %30 = vector.load %arg6[%c0_19, %c0_20, %c0_21] : memref<2x64x1024xf32, #tpu.memory_space<vmem>>, vector<2x64x1024xf32>
    tpu.vector_store %arg6[%c0_19, %c0_20, %c0_21], %29 {strides = array<i32>} : memref<2x64x1024xf32, #tpu.memory_space<vmem>>, vector<2x64x1024xf32>,
    return
  }
  func.func @transform_0(%arg0: i32) -> (i32, i32, i32) {
    %c0_i32 = arith.constant 0 : i32
    %c0_i32_0 = arith.constant 0 : i32
    %c0_i32_1 = arith.constant 0 : i32
    return %arg0, %c0_i32, %c0_i32_0 : i32, i32, i32
  }
  func.func @transform_1(%arg0: i32) -> (i32, i32, i32) {
    %c0_i32 = arith.constant 0 : i32
    %c0_i32_0 = arith.constant 0 : i32
    %c0_i32_1 = arith.constant 0 : i32
    return %arg0, %c0_i32, %c0_i32_0 : i32, i32, i32
  }
  func.func @transform_2(%arg0: i32) -> (i32, i32) {
    %c0_i32 = arith.constant 0 : i32
    %c0_i32_0 = arith.constant 0 : i32
    %c0_i32_1 = arith.constant 0 : i32
    return %c0_i32, %c0_i32_0 : i32, i32
  }
  func.func @transform_3(%arg0: i32) -> (i32, i32) {
    %c0_i32 = arith.constant 0 : i32
    %c0_i32_0 = arith.constant 0 : i32
    %c0_i32_1 = arith.constant 0 : i32
    return %c0_i32, %c0_i32_0 : i32, i32
  }
  func.func @transform_4(%arg0: i32) -> (i32, i32) {
    %c0_i32 = arith.constant 0 : i32
    %c0_i32_0 = arith.constant 0 : i32
    %c0_i32_1 = arith.constant 0 : i32
    return %c0_i32, %c0_i32_0 : i32, i32
  }
  func.func @transform_5(%arg0: i32) -> (i32, i32, i32) {
    %c0_i32 = arith.constant 0 : i32
    %c0_i32_0 = arith.constant 0 : i32
    %c0_i32_1 = arith.constant 0 : i32
    return %arg0, %c0_i32, %c0_i32_0 : i32, i32, i32
  }
}

</mosaic_0001>

<bundles_post_ra>
// kernel: tpu_custom_call.1
= control target key start
LH: loop header
LB: loop body
LE: loop exit
PB: predicated region body
PF: predicated region fallthrough
CT: control target
= control target key end

     0   :  { %10 = vsyncpa [#allocation3], 0  ;;  %s2415_s0 = inlined_call_operand.hbm [shape: f32[2,64,1024], index: 0, kind: input, shape index: {}]   ;;  %s2416_s1 = inlined_call_operand.hbm [shape: f32[2,64,1024], index: 1, kind: input, shape index: {}]   ;;  %s2417_s2 = inlined_call_operand.vmem [shape: f32[64,16], index: 2, kind: input, shape index: {}]   ;;  %s2418_s3 = inlined_call_operand.vmem [shape: f32[64,16], index: 3, kind: input, shape index: {}]   ;;  %s2419_s4 = inlined_call_operand.vmem [shape: f32[16,128], index: 4, kind: input, shape index: {}]   ;;  %s2420_s5 = inlined_call_operand.hbm [shape: f32[2,64,1024], index: 5, kind: output, shape index: {}]  }
   0x1   :  { %11 = vsyncpa [#allocation6], 0 }
   0x2   :  { %12 = vsyncpa [#allocation4], 0  ;;  %s17_s20 = sshll.u32 %s2415_s0, 4  ;;  %s1911_s21 = smov [#allocation2]   ;;  %s18_s20 = int_to_ptr.hbm [resolvable:$true] %s17_s20 }
   0x3   :  { %s19_s22 = sshll.u32 %s1911_s21, 4  ;;  %s30_s25 = sshll.u32 %s2416_s1, 4  ;;  %s20_s22 = int_to_ptr.vmem [resolvable:$true] %s19_s22  ;;  %s31_s25 = int_to_ptr.hbm [resolvable:$true] %s30_s25 }
   0x4   :  { %s1912_s26 = smov 1024   ;;  %s1913_s27 = smov 64  }
   0x5   :  { %25 = dma.hbm_to_vmem [thread:$0]  %s18_s20, 16384, %s20_s22, [#allocation3], %s1912_s26, %s1912_s26, %s1913_s27  }
   0x6   :  { %s1914_s28 = smov [#allocation5]  }
   0x7   :  { %s32_s29 = sshll.u32 %s1914_s28, 4  ;;  %s33_s29 = int_to_ptr.vmem [resolvable:$true] %s32_s29 }
   0x8   :  { %38 = dma.hbm_to_vmem [thread:$0]  %s31_s25, 16384, %s33_s29, [#allocation6], %s1912_s26, %s1912_s26, %s1913_s27  }
   0x9   :  { %1905 = dma.done.wait [#allocation3], 16384  }
   0xa   :  { %1906 = vsyncadd [#allocation3], 4294950912 }
   0xb   :  { %1907 = dma.done.wait [#allocation6], 16384  }
   0xc   :  { %1908 = vsyncadd [#allocation6], 4294950912  ;;  %v181_v0 = vld [vmem:[#allocation5] sm:$0xff]  ;;  %v182_v1 = vld [vmem:[#allocation5 + $0x8] sm:$0xff]  ;;  %vm634_vm0 = vcmask 130112   ;;  %vm638_vm1 = vcmask 195712  }
   0xd   :  { %v183_v2 = vld [vmem:[#allocation5 + $0x10] sm:$0xff]  ;;  %v453_v3 = vadd.f32 %v182_v1, %v181_v0  ;;  %v184_v4 = vld [vmem:[#allocation5 + $0x18] sm:$0xff]  ;;  %v117_v5 = vld [vmem:[#allocation2 + $0x200] sm:$0xff]  ;;  %vm642_vm2 = vcmask 261312   ;;  %vm646_vm3 = vcmask 326912   ;;  %vm650_vm4 = vcmask 392512  }
   0xe   :  { %v118_v7 = vld [vmem:[#allocation2 + $0x208] sm:$0xff]  ;;  %v119_v8 = vld [vmem:[#allocation2 + $0x210] sm:$0xff]  ;;  %v185_v9 = vld [vmem:[#allocation5 + $0x20] sm:$0xff]  ;;  %vm654_vm5 = vcmask 458112   ;;  %vm658_vm6 = vcmask 523712   ;;  %vm675_vm7 = vcmask 1041409  }
   0xf   :  { %v454_v6 = vadd.f32 %v453_v3, %v183_v2  ;;  %v381_v10 = vadd.f32 %v118_v7, %v117_v5  ;;  %v120_v12 = vld [vmem:[#allocation2 + $0x218] sm:$0xff]  ;;  %v53_v13 = vld [vmem:[#allocation2] sm:$0xff]  ;;  %v54_v14 = vld [vmem:[#allocation2 + $0x8] sm:$0xff]  ;;  %vm677_vm8 = vcmask 523264   ;;  %vm772_vm9 = vcmask 130048   ;;  %s1534_s15 = sshll.u32 %s2420_s5, 4  ;;  %s1535_s15 = int_to_ptr.hbm [resolvable:$true] %s1534_s15 }
  0x10   :  { %v186_v15 = vld [vmem:[#allocation5 + $0x28] sm:$0xff]  ;;  %v55_v17 = vld [vmem:[#allocation2 + $0x10] sm:$0xff]  ;;  %v309_v18 = vadd.f32 %v54_v14, %v53_v13  ;;  %v121_v21 = vld [vmem:[#allocation2 + $0x220] sm:$0xff] }
  0x11   :  { %v455_v11 = vadd.f32 %v454_v6, %v184_v4  ;;  %v382_v16 = vadd.f32 %v381_v10, %v119_v8  ;;  %v187_v19 = vld [vmem:[#allocation5 + $0x30] sm:$0xff]  ;;  %v56_v22 = vld [vmem:[#allocation2 + $0x18] sm:$0xff]  ;;  %v189_v25 = vld [vmem:[#allocation5 + $0x40] sm:$0xff] }
  0x12   :  { %v310_v24 = vadd.f32 %v309_v18, %v55_v17  ;;  %v190_v26 = vld [vmem:[#allocation5 + $0x48] sm:$0xff]  ;;  %v191_v27 = vld [vmem:[#allocation5 + $0x50] sm:$0xff]  ;;  %v188_v28 = vld [vmem:[#allocation5 + $0x38] sm:$0xff] }
  0x13   :  { %v456_v20 = vadd.f32 %v455_v11, %v185_v9  ;;  %v383_v23 = vadd.f32 %v382_v16, %v120_v12  ;;  %v122_v30 = vld [vmem:[#allocation2 + $0x228] sm:$0xff]  ;;  %v57_v31 = vld [vmem:[#allocation2 + $0x20] sm:$0xff]  ;;  %v462_v32 = vadd.f32 %v190_v26, %v189_v25  ;;  %v123_v33 = vld [vmem:[#allocation2 + $0x230] sm:$0xff] }
  0x14   :  { %v311_v35 = vadd.f32 %v310_v24, %v56_v22  ;;  %v192_v36 = vld [vmem:[#allocation5 + $0x58] sm:$0xff]  ;;  %v125_v37 = vld [vmem:[#allocation2 + $0x240] sm:$0xff]  ;;  %v58_v39 = vld [vmem:[#allocation2 + $0x28] sm:$0xff] }
  0x15   :  { %v457_v29 = vadd.f32 %v456_v20, %v186_v15  ;;  %v384_v34 = vadd.f32 %v383_v23, %v121_v21  ;;  %v463_v40 = vadd.f32 %v462_v32, %v191_v27  ;;  %v126_v41 = vld [vmem:[#allocation2 + $0x248] sm:$0xff]  ;;  %v127_v42 = vld [vmem:[#allocation2 + $0x250] sm:$0xff]  ;;  %v124_v43 = vld [vmem:[#allocation2 + $0x238] sm:$0xff] }
  0x16   :  { %v59_v45 = vld [vmem:[#allocation2 + $0x30] sm:$0xff]  ;;  %v312_v46 = vadd.f32 %v311_v35, %v57_v31  ;;  %v193_v47 = vld [vmem:[#allocation5 + $0x60] sm:$0xff]  ;;  %v390_v48 = vadd.f32 %v126_v41, %v125_v37  ;;  %v128_v51 = vld [vmem:[#allocation2 + $0x258] sm:$0xff] }
  0x17   :  { %v458_v38 = vadd.f32 %v457_v29, %v187_v19  ;;  %v385_v44 = vadd.f32 %v384_v34, %v122_v30  ;;  %v464_v50 = vadd.f32 %v463_v40, %v192_v36  ;;  %v61_v52 = vld [vmem:[#allocation2 + $0x40] sm:$0xff]  ;;  %v62_v53 = vld [vmem:[#allocation2 + $0x48] sm:$0xff]  ;;  %v60_v55 = vld [vmem:[#allocation2 + $0x38] sm:$0xff] }
  0x18   :  { %v313_v56 = vadd.f32 %v312_v46, %v58_v39  ;;  %v194_v57 = vld [vmem:[#allocation5 + $0x68] sm:$0xff]  ;;  %v391_v58 = vadd.f32 %v390_v48, %v127_v42  ;;  %v63_v59 = vld [vmem:[#allocation2 + $0x50] sm:$0xff]  ;;  %v318_v60 = vadd.f32 %v62_v53, %v61_v52  ;;  %v129_v63 = vld [vmem:[#allocation2 + $0x260] sm:$0xff] }
  0x19   :  { %v459_v49 = vadd.f32 %v458_v38, %v188_v28  ;;  %v386_v54 = vadd.f32 %v385_v44, %v123_v33  ;;  %v195_v61 = vld [vmem:[#allocation5 + $0x70] sm:$0xff]  ;;  %v465_v62 = vadd.f32 %v464_v50, %v193_v47  ;;  %v64_v0 = vld [vmem:[#allocation2 + $0x58] sm:$0xff]  ;;  %v253_v5 = vld [vmem:[#allocation5 + $0x240] sm:$0xff] }
  0x1a   :  { %v314_v2 = vadd.f32 %v313_v56, %v59_v45  ;;  %v392_v3 = vadd.f32 %v391_v58, %v128_v51  ;;  %v319_v4 = vadd.f32 %v318_v60, %v63_v59  ;;  %v254_v6 = vld [vmem:[#allocation5 + $0x248] sm:$0xff]  ;;  %v255_v7 = vld [vmem:[#allocation5 + $0x250] sm:$0xff]  ;;  %v196_v8 = vld [vmem:[#allocation5 + $0x78] sm:$0xff] }
  0x1b   :  { %460 = vadd.xlane.f32.xlu2 %v459_v49  ;;  %v387_v1 = vadd.f32 %v386_v54, %v124_v43  ;;  %v466_v9 = vadd.f32 %v465_v62, %v194_v57  ;;  %v130_v10 = vld [vmem:[#allocation2 + $0x268] sm:$0xff]  ;;  %v65_v11 = vld [vmem:[#allocation2 + $0x60] sm:$0xff]  ;;  %v534_v12 = vadd.f32 %v254_v6, %v253_v5  ;;  %v131_v14 = vld [vmem:[#allocation2 + $0x270] sm:$0xff] }
  0x1c   :  { %v315_v13 = vadd.f32 %v314_v2, %v60_v55  ;;  %v393_v15 = vadd.f32 %v392_v3, %v129_v63  ;;  %v320_v16 = vadd.f32 %v319_v4, %v64_v0  ;;  %v256_v17 = vld [vmem:[#allocation5 + $0x258] sm:$0xff]  ;;  %v69_v18 = vld [vmem:[#allocation2 + $0x80] sm:$0xff]  ;;  %v66_v20 = vld [vmem:[#allocation2 + $0x68] sm:$0xff] }
  0x1d   :  { %388 = vadd.xlane.f32.xlu1 %v387_v1  ;;  %v467_v19 = vadd.f32 %v466_v9, %v195_v61  ;;  %v535_v21 = vadd.f32 %v534_v12, %v255_v7  ;;  %v70_v22 = vld [vmem:[#allocation2 + $0x88] sm:$0xff]  ;;  %v71_v23 = vld [vmem:[#allocation2 + $0x90] sm:$0xff]  ;;  %v132_v24 = vld [vmem:[#allocation2 + $0x278] sm:$0xff] }
  0x1e   :  { %316 = vadd.xlane.f32.xlu0 %v315_v13  ;;  %v394_v25 = vadd.f32 %v393_v15, %v130_v10  ;;  %v67_v26 = vld [vmem:[#allocation2 + $0x70] sm:$0xff]  ;;  %v321_v27 = vadd.f32 %v320_v16, %v65_v11  ;;  %v257_v28 = vld [vmem:[#allocation5 + $0x260] sm:$0xff]  ;;  %v327_v29 = vadd.f32 %v70_v22, %v69_v18  ;;  %v72_v32 = vld [vmem:[#allocation2 + $0x98] sm:$0xff] }
  0x1f   :  { %v468_v30 = vadd.f32 %v467_v19, %v196_v8  ;;  %v536_v31 = vadd.f32 %v535_v21, %v256_v17  ;;  %v245_v33 = vld [vmem:[#allocation5 + $0x200] sm:$0xff]  ;;  %v246_v34 = vld [vmem:[#allocation5 + $0x208] sm:$0xff]  ;;  %v68_v36 = vld [vmem:[#allocation2 + $0x78] sm:$0xff] }
  0x20   :  { %v395_v35 = vadd.f32 %v394_v25, %v131_v14  ;;  %v322_v37 = vadd.f32 %v321_v27, %v66_v20  ;;  %v258_v38 = vld [vmem:[#allocation5 + $0x268] sm:$0xff]  ;;  %v328_v39 = vadd.f32 %v327_v29, %v71_v23  ;;  %v247_v40 = vld [vmem:[#allocation5 + $0x210] sm:$0xff]  ;;  %v525_v41 = vadd.f32 %v246_v34, %v245_v33  ;;  %v73_v44 = vld [vmem:[#allocation2 + $0xa0] sm:$0xff] }
  0x21   :  { %v259_v42 = vld [vmem:[#allocation5 + $0x270] sm:$0xff]  ;;  %v537_v43 = vadd.f32 %v536_v31, %v257_v28  ;;  %v248_v45 = vld [vmem:[#allocation5 + $0x218] sm:$0xff]  ;;  %v197_v50 = vld [vmem:[#allocation5 + $0x80] sm:$0xff] }
  0x22   :  { %v396_v46 = vadd.f32 %v395_v35, %v132_v24  ;;  %v323_v47 = vadd.f32 %v322_v37, %v67_v26  ;;  %v329_v48 = vadd.f32 %v328_v39, %v72_v32  ;;  %v526_v49 = vadd.f32 %v525_v41, %v247_v40  ;;  %v198_v51 = vld [vmem:[#allocation5 + $0x88] sm:$0xff]  ;;  %v199_v52 = vld [vmem:[#allocation5 + $0x90] sm:$0xff]  ;;  %v260_v53 = vld [vmem:[#allocation5 + $0x278] sm:$0xff] }
  0x23   :  { %469 = vadd.xlane.f32.xlu2 %v468_v30  ;;  %v538_v54 = vadd.f32 %v537_v43, %v258_v38  ;;  %v74_v55 = vld [vmem:[#allocation2 + $0xa8] sm:$0xff]  ;;  %v249_v56 = vld [vmem:[#allocation5 + $0x220] sm:$0xff]  ;;  %v471_v57 = vadd.f32 %v198_v51, %v197_v50  ;;  %v75_v59 = vld [vmem:[#allocation2 + $0xb0] sm:$0xff] }
  0x24   :  { %v324_v58 = vadd.f32 %v323_v47, %v68_v36  ;;  %v330_v60 = vadd.f32 %v329_v48, %v73_v44  ;;  %v527_v61 = vadd.f32 %v526_v49, %v248_v45  ;;  %v200_v62 = vld [vmem:[#allocation5 + $0x98] sm:$0xff]  ;;  %v261_v63 = vld [vmem:[#allocation5 + $0x280] sm:$0xff]  ;;  %v250_v1 = vld [vmem:[#allocation5 + $0x228] sm:$0xff] }
  0x25   :  { %397 = vadd.xlane.f32.xlu1 %v396_v46  ;;  %v539_v0 = vadd.f32 %v538_v54, %v259_v42  ;;  %v472_v2 = vadd.f32 %v471_v57, %v199_v52  ;;  %v262_v3 = vld [vmem:[#allocation5 + $0x288] sm:$0xff]  ;;  %v263_v4 = vld [vmem:[#allocation5 + $0x290] sm:$0xff]  ;;  %v76_v5 = vld [vmem:[#allocation2 + $0xb8] sm:$0xff] }
  0x26   :  { %325 = vadd.xlane.f32.xlu0 %v324_v58  ;;  %v331_v6 = vadd.f32 %v330_v60, %v74_v55  ;;  %v251_v7 = vld [vmem:[#allocation5 + $0x230] sm:$0xff]  ;;  %v528_v8 = vadd.f32 %v527_v61, %v249_v56  ;;  %v201_v9 = vld [vmem:[#allocation5 + $0xa0] sm:$0xff]  ;;  %v543_v10 = vadd.f32 %v262_v3, %v261_v63  ;;  %v264_v13 = vld [vmem:[#allocation5 + $0x298] sm:$0xff] }
  0x27   :  { %v540_v11 = vadd.f32 %v539_v0, %v260_v53  ;;  %v473_v12 = vadd.f32 %v472_v2, %v200_v62  ;;  %v133_v14 = vld [vmem:[#allocation2 + $0x280] sm:$0xff]  ;;  %v134_v15 = vld [vmem:[#allocation2 + $0x288] sm:$0xff]  ;;  %v252_v17 = vld [vmem:[#allocation5 + $0x238] sm:$0xff] }
  0x28   :  { %v332_v16 = vadd.f32 %v331_v6, %v75_v59  ;;  %v529_v18 = vadd.f32 %v528_v8, %v250_v1  ;;  %v202_v19 = vld [vmem:[#allocation5 + $0xa8] sm:$0xff]  ;;  %v544_v20 = vadd.f32 %v543_v10, %v263_v4  ;;  %v135_v21 = vld [vmem:[#allocation2 + $0x290] sm:$0xff]  ;;  %v399_v22 = vadd.f32 %v134_v15, %v133_v14  ;;  %v265_v25 = vld [vmem:[#allocation5 + $0x2a0] sm:$0xff] }
  0x29   :  { %v203_v23 = vld [vmem:[#allocation5 + $0xb0] sm:$0xff]  ;;  %v474_v24 = vadd.f32 %v473_v12, %v201_v9  ;;  %v136_v26 = vld [vmem:[#allocation2 + $0x298] sm:$0xff]  ;;  %v141_v31 = vld [vmem:[#allocation2 + $0x2c0] sm:$0xff] }
  0x2a   :  { %v333_v27 = vadd.f32 %v332_v16, %v76_v5  ;;  %v530_v28 = vadd.f32 %v529_v18, %v251_v7  ;;  %v545_v29 = vadd.f32 %v544_v20, %v264_v13  ;;  %v400_v30 = vadd.f32 %v399_v22, %v135_v21  ;;  %v142_v32 = vld [vmem:[#allocation2 + $0x2c8] sm:$0xff]  ;;  %v143_v33 = vld [vmem:[#allocation2 + $0x2d0] sm:$0xff]  ;;  %v204_v34 = vld [vmem:[#allocation5 + $0xb8] sm:$0xff] }
  0x2b   :  { %v475_v35 = vadd.f32 %v474_v24, %v202_v19  ;;  %v266_v36 = vld [vmem:[#allocation5 + $0x2a8] sm:$0xff]  ;;  %v137_v37 = vld [vmem:[#allocation2 + $0x2a0] sm:$0xff]  ;;  %v408_v38 = vadd.f32 %v142_v32, %v141_v31  ;;  %v267_v40 = vld [vmem:[#allocation5 + $0x2b0] sm:$0xff] }
  0x2c   :  { %334 = vadd.xlane.f32.xlu2 %v333_v27  ;;  %v531_v39 = vadd.f32 %v530_v28, %v252_v17  ;;  %v546_v41 = vadd.f32 %v545_v29, %v265_v25  ;;  %v401_v42 = vadd.f32 %v400_v30, %v136_v26  ;;  %v144_v43 = vld [vmem:[#allocation2 + $0x2d8] sm:$0xff]  ;;  %v205_v44 = vld [vmem:[#allocation5 + $0xc0] sm:$0xff]  ;;  %v138_v46 = vld [vmem:[#allocation2 + $0x2a8] sm:$0xff] }
  0x2d   :  { %541 = vadd.xlane.f32.xlu1 %v540_v11  ;;  %v476_v45 = vadd.f32 %v475_v35, %v203_v23  ;;  %v409_v47 = vadd.f32 %v408_v38, %v143_v33  ;;  %v206_v48 = vld [vmem:[#allocation5 + $0xc8] sm:$0xff]  ;;  %v207_v49 = vld [vmem:[#allocation5 + $0xd0] sm:$0xff]  ;;  %v268_v50 = vld [vmem:[#allocation5 + $0x2b8] sm:$0xff] }
  0x2e   :  { %532 = vadd.xlane.f32.xlu0 %v531_v39  ;;  %v547_v51 = vadd.f32 %v546_v41, %v266_v36  ;;  %v139_v52 = vld [vmem:[#allocation2 + $0x2b0] sm:$0xff]  ;;  %v402_v53 = vadd.f32 %v401_v42, %v137_v37  ;;  %v145_v54 = vld [vmem:[#allocation2 + $0x2e0] sm:$0xff]  ;;  %v480_v55 = vadd.f32 %v206_v48, %v205_v44  ;;  %v208_v58 = vld [vmem:[#allocation5 + $0xd8] sm:$0xff] }
  0x2f   :  { %v477_v56 = vadd.f32 %v476_v45, %v204_v34  ;;  %v410_v57 = vadd.f32 %v409_v47, %v144_v43  ;;  %v77_v59 = vld [vmem:[#allocation2 + $0xc0] sm:$0xff]  ;;  %v78_v60 = vld [vmem:[#allocation2 + $0xc8] sm:$0xff]  ;;  %v140_v62 = vld [vmem:[#allocation2 + $0x2b8] sm:$0xff] }
  0x30   :  { %v548_v61 = vadd.f32 %v547_v51, %v267_v40  ;;  %v403_v63 = vadd.f32 %v402_v53, %v138_v46  ;;  %v146_v0 = vld [vmem:[#allocation2 + $0x2e8] sm:$0xff]  ;;  %v481_v1 = vadd.f32 %v480_v55, %v207_v49  ;;  %v79_v2 = vld [vmem:[#allocation2 + $0xd0] sm:$0xff]  ;;  %v336_v3 = vadd.f32 %v78_v60, %v77_v59  ;;  %v209_v6 = vld [vmem:[#allocation5 + $0xe0] sm:$0xff] }
  0x31   :  { %v147_v4 = vld [vmem:[#allocation2 + $0x2f0] sm:$0xff]  ;;  %v411_v5 = vadd.f32 %v410_v57, %v145_v54  ;;  %v80_v7 = vld [vmem:[#allocation2 + $0xd8] sm:$0xff]  ;;  %v85_v12 = vld [vmem:[#allocation2 + $0x100] sm:$0xff] }
  0x32   :  { %v549_v8 = vadd.f32 %v548_v61, %v268_v50  ;;  %v404_v9 = vadd.f32 %v403_v63, %v139_v52  ;;  %v482_v10 = vadd.f32 %v481_v1, %v208_v58  ;;  %v337_v11 = vadd.f32 %v336_v3, %v79_v2  ;;  %v86_v13 = vld [vmem:[#allocation2 + $0x108] sm:$0xff]  ;;  %v87_v14 = vld [vmem:[#allocation2 + $0x110] sm:$0xff]  ;;  %v148_v15 = vld [vmem:[#allocation2 + $0x2f8] sm:$0xff] }
  0x33   :  { %v412_v16 = vadd.f32 %v411_v5, %v146_v0  ;;  %v210_v17 = vld [vmem:[#allocation5 + $0xe8] sm:$0xff]  ;;  %v81_v18 = vld [vmem:[#allocation2 + $0xe0] sm:$0xff]  ;;  %v345_v19 = vadd.f32 %v86_v13, %v85_v12  ;;  %v211_v21 = vld [vmem:[#allocation5 + $0xf0] sm:$0xff] }
  0x34   :  { %550 = vadd.xlane.f32.xlu2 %v549_v8  ;;  %v405_v20 = vadd.f32 %v404_v9, %v140_v62  ;;  %v483_v22 = vadd.f32 %v482_v10, %v209_v6  ;;  %v338_v23 = vadd.f32 %v337_v11, %v80_v7  ;;  %v88_v24 = vld [vmem:[#allocation2 + $0x118] sm:$0xff]  ;;  %v149_v25 = vld [vmem:[#allocation2 + $0x300] sm:$0xff]  ;;  %v82_v27 = vld [vmem:[#allocation2 + $0xe8] sm:$0xff] }
  0x35   :  { %478 = vadd.xlane.f32.xlu1 %v477_v56  ;;  %v413_v26 = vadd.f32 %v412_v16, %v147_v4  ;;  %v346_v28 = vadd.f32 %v345_v19, %v87_v14  ;;  %v150_v29 = vld [vmem:[#allocation2 + $0x308] sm:$0xff]  ;;  %v151_v30 = vld [vmem:[#allocation2 + $0x310] sm:$0xff]  ;;  %v212_v31 = vld [vmem:[#allocation5 + $0xf8] sm:$0xff] }
  0x36   :  { %406 = vadd.xlane.f32.xlu0 %v405_v20  ;;  %v484_v32 = vadd.f32 %v483_v22, %v210_v17  ;;  %v83_v33 = vld [vmem:[#allocation2 + $0xf0] sm:$0xff]  ;;  %v339_v34 = vadd.f32 %v338_v23, %v81_v18  ;;  %v89_v35 = vld [vmem:[#allocation2 + $0x120] sm:$0xff]  ;;  %v417_v36 = vadd.f32 %v150_v29, %v149_v25  ;;  %v152_v39 = vld [vmem:[#allocation2 + $0x318] sm:$0xff] }
  0x37   :  { %v414_v37 = vadd.f32 %v413_v26, %v148_v15  ;;  %v347_v38 = vadd.f32 %v346_v28, %v88_v24  ;;  %v269_v40 = vld [vmem:[#allocation5 + $0x2c0] sm:$0xff]  ;;  %v270_v41 = vld [vmem:[#allocation5 + $0x2c8] sm:$0xff]  ;;  %v84_v43 = vld [vmem:[#allocation2 + $0xf8] sm:$0xff] }
  0x38   :  { %v485_v42 = vadd.f32 %v484_v32, %v211_v21  ;;  %v340_v44 = vadd.f32 %v339_v34, %v82_v27  ;;  %v90_v45 = vld [vmem:[#allocation2 + $0x128] sm:$0xff]  ;;  %v418_v46 = vadd.f32 %v417_v36, %v151_v30  ;;  %v271_v47 = vld [vmem:[#allocation5 + $0x2d0] sm:$0xff]  ;;  %v552_v48 = vadd.f32 %v270_v41, %v269_v40  ;;  %v153_v51 = vld [vmem:[#allocation2 + $0x320] sm:$0xff] }
  0x39   :  { %v91_v49 = vld [vmem:[#allocation2 + $0x130] sm:$0xff]  ;;  %v348_v50 = vadd.f32 %v347_v38, %v89_v35  ;;  %v272_v52 = vld [vmem:[#allocation5 + $0x2d8] sm:$0xff]  ;;  %v277_v57 = vld [vmem:[#allocation5 + $0x300] sm:$0xff] }
  0x3a   :  { %v486_v53 = vadd.f32 %v485_v42, %v212_v31  ;;  %v341_v54 = vadd.f32 %v340_v44, %v83_v33  ;;  %v419_v55 = vadd.f32 %v418_v46, %v152_v39  ;;  %v553_v56 = vadd.f32 %v552_v48, %v271_v47  ;;  %v278_v58 = vld [vmem:[#allocation5 + $0x308] sm:$0xff]  ;;  %v279_v59 = vld [vmem:[#allocation5 + $0x310] sm:$0xff]  ;;  %v92_v60 = vld [vmem:[#allocation2 + $0x138] sm:$0xff] }
  0x3b   :  { %v349_v61 = vadd.f32 %v348_v50, %v90_v45  ;;  %v154_v62 = vld [vmem:[#allocation2 + $0x328] sm:$0xff]  ;;  %v273_v63 = vld [vmem:[#allocation5 + $0x2e0] sm:$0xff]  ;;  %v561_v0 = vadd.f32 %v278_v58, %v277_v57  ;;  %v155_v2 = vld [vmem:[#allocation2 + $0x330] sm:$0xff] }
  0x3c   :  { %487 = vadd.xlane.f32.xlu2 %v486_v53  ;;  %v342_v1 = vadd.f32 %v341_v54, %v84_v43  ;;  %v420_v3 = vadd.f32 %v419_v55, %v153_v51  ;;  %v554_v4 = vadd.f32 %v553_v56, %v272_v52  ;;  %v280_v5 = vld [vmem:[#allocation5 + $0x318] sm:$0xff]  ;;  %v93_v6 = vld [vmem:[#allocation2 + $0x140] sm:$0xff]  ;;  %v274_v8 = vld [vmem:[#allocation5 + $0x2e8] sm:$0xff] }
  0x3d   :  { %415 = vadd.xlane.f32.xlu1 %v414_v37  ;;  %v350_v7 = vadd.f32 %v349_v61, %v91_v49  ;;  %v562_v9 = vadd.f32 %v561_v0, %v279_v59  ;;  %v94_v10 = vld [vmem:[#allocation2 + $0x148] sm:$0xff]  ;;  %v95_v11 = vld [vmem:[#allocation2 + $0x150] sm:$0xff]  ;;  %v156_v12 = vld [vmem:[#allocation2 + $0x338] sm:$0xff] }
  0x3e   :  { %343 = vadd.xlane.f32.xlu0 %v342_v1  ;;  %v421_v13 = vadd.f32 %v420_v3, %v154_v62  ;;  %v275_v14 = vld [vmem:[#allocation5 + $0x2f0] sm:$0xff]  ;;  %v555_v15 = vadd.f32 %v554_v4, %v273_v63  ;;  %v281_v16 = vld [vmem:[#allocation5 + $0x320] sm:$0xff]  ;;  %v354_v17 = vadd.f32 %v94_v10, %v93_v6  ;;  %v96_v20 = vld [vmem:[#allocation2 + $0x158] sm:$0xff] }
  0x3f   :  { %v351_v18 = vadd.f32 %v350_v7, %v92_v60  ;;  %v563_v19 = vadd.f32 %v562_v9, %v280_v5  ;;  %v213_v21 = vld [vmem:[#allocation5 + $0x100] sm:$0xff]  ;;  %v214_v22 = vld [vmem:[#allocation5 + $0x108] sm:$0xff]  ;;  %v276_v24 = vld [vmem:[#allocation5 + $0x2f8] sm:$0xff] }
  0x40   :  { %v422_v23 = vadd.f32 %v421_v13, %v155_v2  ;;  %v556_v25 = vadd.f32 %v555_v15, %v274_v8  ;;  %v282_v26 = vld [vmem:[#allocation5 + $0x328] sm:$0xff]  ;;  %v355_v27 = vadd.f32 %v354_v17, %v95_v11  ;;  %v215_v28 = vld [vmem:[#allocation5 + $0x110] sm:$0xff]  ;;  %v489_v29 = vadd.f32 %v214_v22, %v213_v21  ;;  %v97_v32 = vld [vmem:[#allocation2 + $0x160] sm:$0xff] }
  0x41   :  { %v283_v30 = vld [vmem:[#allocation5 + $0x330] sm:$0xff]  ;;  %v564_v31 = vadd.f32 %v563_v19, %v281_v16  ;;  %v216_v33 = vld [vmem:[#allocation5 + $0x118] sm:$0xff]  ;;  %v221_v38 = vld [vmem:[#allocation5 + $0x140] sm:$0xff] }
  0x42   :  { %v423_v34 = vadd.f32 %v422_v23, %v156_v12  ;;  %v557_v35 = vadd.f32 %v556_v25, %v275_v14  ;;  %v356_v36 = vadd.f32 %v355_v27, %v96_v20  ;;  %v490_v37 = vadd.f32 %v489_v29, %v215_v28  ;;  %v222_v39 = vld [vmem:[#allocation5 + $0x148] sm:$0xff]  ;;  %v223_v40 = vld [vmem:[#allocation5 + $0x150] sm:$0xff]  ;;  %v284_v41 = vld [vmem:[#allocation5 + $0x338] sm:$0xff] }
  0x43   :  { %v565_v42 = vadd.f32 %v564_v31, %v282_v26  ;;  %v98_v43 = vld [vmem:[#allocation2 + $0x168] sm:$0xff]  ;;  %v217_v44 = vld [vmem:[#allocation5 + $0x120] sm:$0xff]  ;;  %v498_v45 = vadd.f32 %v222_v39, %v221_v38  ;;  %v99_v47 = vld [vmem:[#allocation2 + $0x170] sm:$0xff] }
  0x44   :  { %424 = vadd.xlane.f32.xlu2 %v423_v34  ;;  %v558_v46 = vadd.f32 %v557_v35, %v276_v24  ;;  %v357_v48 = vadd.f32 %v356_v36, %v97_v32  ;;  %v491_v49 = vadd.f32 %v490_v37, %v216_v33  ;;  %v224_v50 = vld [vmem:[#allocation5 + $0x158] sm:$0xff]  ;;  %v285_v51 = vld [vmem:[#allocation5 + $0x340] sm:$0xff]  ;;  %v218_v53 = vld [vmem:[#allocation5 + $0x128] sm:$0xff] }
  0x45   :  { %352 = vadd.xlane.f32.xlu1 %v351_v18  ;;  %v566_v52 = vadd.f32 %v565_v42, %v283_v30  ;;  %v499_v54 = vadd.f32 %v498_v45, %v223_v40  ;;  %v286_v55 = vld [vmem:[#allocation5 + $0x348] sm:$0xff]  ;;  %v287_v56 = vld [vmem:[#allocation5 + $0x350] sm:$0xff]  ;;  %v100_v57 = vld [vmem:[#allocation2 + $0x178] sm:$0xff] }
  0x46   :  { %559 = vadd.xlane.f32.xlu0 %v558_v46  ;;  %v358_v58 = vadd.f32 %v357_v48, %v98_v43  ;;  %v219_v59 = vld [vmem:[#allocation5 + $0x130] sm:$0xff]  ;;  %v492_v60 = vadd.f32 %v491_v49, %v217_v44  ;;  %v225_v61 = vld [vmem:[#allocation5 + $0x160] sm:$0xff]  ;;  %v570_v62 = vadd.f32 %v286_v55, %v285_v51  ;;  %v288_v1 = vld [vmem:[#allocation5 + $0x358] sm:$0xff] }
  0x47   :  { %v567_v63 = vadd.f32 %v566_v52, %v284_v41  ;;  %v500_v0 = vadd.f32 %v499_v54, %v224_v50  ;;  %v157_v2 = vld [vmem:[#allocation2 + $0x340] sm:$0xff]  ;;  %v158_v3 = vld [vmem:[#allocation2 + $0x348] sm:$0xff]  ;;  %v220_v5 = vld [vmem:[#allocation5 + $0x138] sm:$0xff] }
  0x48   :  { %v359_v4 = vadd.f32 %v358_v58, %v99_v47  ;;  %v493_v6 = vadd.f32 %v492_v60, %v218_v53  ;;  %v226_v7 = vld [vmem:[#allocation5 + $0x168] sm:$0xff]  ;;  %v571_v8 = vadd.f32 %v570_v62, %v287_v56  ;;  %v159_v9 = vld [vmem:[#allocation2 + $0x350] sm:$0xff]  ;;  %v426_v10 = vadd.f32 %v158_v3, %v157_v2  ;;  %v289_v13 = vld [vmem:[#allocation5 + $0x360] sm:$0xff] }
  0x49   :  { %v227_v11 = vld [vmem:[#allocation5 + $0x170] sm:$0xff]  ;;  %v501_v12 = vadd.f32 %v500_v0, %v225_v61  ;;  %v160_v14 = vld [vmem:[#allocation2 + $0x358] sm:$0xff]  ;;  %v165_v19 = vld [vmem:[#allocation2 + $0x380] sm:$0xff] }
  0x4a   :  { %v360_v15 = vadd.f32 %v359_v4, %v100_v57  ;;  %v494_v16 = vadd.f32 %v493_v6, %v219_v59  ;;  %v572_v17 = vadd.f32 %v571_v8, %v288_v1  ;;  %v427_v18 = vadd.f32 %v426_v10, %v159_v9  ;;  %v166_v20 = vld [vmem:[#allocation2 + $0x388] sm:$0xff]  ;;  %v167_v21 = vld [vmem:[#allocation2 + $0x390] sm:$0xff]  ;;  %v228_v22 = vld [vmem:[#allocation5 + $0x178] sm:$0xff] }
  0x4b   :  { %v502_v23 = vadd.f32 %v501_v12, %v226_v7  ;;  %v290_v24 = vld [vmem:[#allocation5 + $0x368] sm:$0xff]  ;;  %v161_v25 = vld [vmem:[#allocation2 + $0x360] sm:$0xff]  ;;  %v435_v26 = vadd.f32 %v166_v20, %v165_v19  ;;  %v291_v28 = vld [vmem:[#allocation5 + $0x370] sm:$0xff] }
  0x4c   :  { %361 = vadd.xlane.f32.xlu2 %v360_v15  ;;  %v495_v27 = vadd.f32 %v494_v16, %v220_v5  ;;  %v573_v29 = vadd.f32 %v572_v17, %v289_v13  ;;  %v428_v30 = vadd.f32 %v427_v18, %v160_v14  ;;  %v168_v31 = vld [vmem:[#allocation2 + $0x398] sm:$0xff]  ;;  %v1958_v32 = vld [vmem:[#allocation5 + $0x180] sm:$0xff]  ;;  %v162_v34 = vld [vmem:[#allocation2 + $0x368] sm:$0xff] }
  0x4d   :  { %568 = vadd.xlane.f32.xlu1 %v567_v63  ;;  %v503_v33 = vadd.f32 %v502_v23, %v227_v11  ;;  %v436_v35 = vadd.f32 %v435_v26, %v167_v21  ;;  %v1960_v36 = vld [vmem:[#allocation5 + $0x188] sm:$0xff]  ;;  %v1962_v37 = vld [vmem:[#allocation5 + $0x190] sm:$0xff]  ;;  %v292_v38 = vld [vmem:[#allocation5 + $0x378] sm:$0xff] }
  0x4e   :  { %496 = vadd.xlane.f32.xlu0 %v495_v27  ;;  %v574_v39 = vadd.f32 %v573_v29, %v290_v24  ;;  %v163_v40 = vld [vmem:[#allocation2 + $0x370] sm:$0xff]  ;;  %v429_v41 = vadd.f32 %v428_v30, %v161_v25  ;;  %v169_v42 = vld [vmem:[#allocation2 + $0x3a0] sm:$0xff]  ;;  %v507_v43 = vadd.f32 %v1960_v36, %v1958_v32  ;;  %v1966_v46 = vld [vmem:[#allocation5 + $0x198] sm:$0xff] }
  0x4f   :  { %v504_v44 = vadd.f32 %v503_v33, %v228_v22  ;;  %v437_v45 = vadd.f32 %v436_v35, %v168_v31  ;;  %v1968_v47 = vld [vmem:[#allocation2 + $0x180] sm:$0xff]  ;;  %v1970_v48 = vld [vmem:[#allocation2 + $0x188] sm:$0xff]  ;;  %v164_v50 = vld [vmem:[#allocation2 + $0x378] sm:$0xff] }
  0x50   :  { %v575_v49 = vadd.f32 %v574_v39, %v291_v28  ;;  %v430_v51 = vadd.f32 %v429_v41, %v162_v34  ;;  %v170_v52 = vld [vmem:[#allocation2 + $0x3a8] sm:$0xff]  ;;  %v508_v53 = vadd.f32 %v507_v43, %v1962_v37  ;;  %v1973_v54 = vld [vmem:[#allocation2 + $0x190] sm:$0xff]  ;;  %v363_v55 = vadd.f32 %v1970_v48, %v1968_v47  ;;  %v1977_v58 = vld [vmem:[#allocation5 + $0x1a0] sm:$0xff] }
  0x51   :  { %v171_v56 = vld [vmem:[#allocation2 + $0x3b0] sm:$0xff]  ;;  %v438_v57 = vadd.f32 %v437_v45, %v169_v42  ;;  %v1979_v59 = vld [vmem:[#allocation2 + $0x198] sm:$0xff]  ;;  %v109_v0 = vld [vmem:[#allocation2 + $0x1c0] sm:$0xff] }
  0x52   :  { %v576_v60 = vadd.f32 %v575_v49, %v292_v38  ;;  %v431_v61 = vadd.f32 %v430_v51, %v163_v40  ;;  %v509_v62 = vadd.f32 %v508_v53, %v1966_v46  ;;  %v364_v63 = vadd.f32 %v363_v55, %v1973_v54  ;;  %v110_v1 = vld [vmem:[#allocation2 + $0x1c8] sm:$0xff]  ;;  %v111_v2 = vld [vmem:[#allocation2 + $0x1d0] sm:$0xff]  ;;  %v172_v3 = vld [vmem:[#allocation2 + $0x3b8] sm:$0xff] }
  0x53   :  { %v439_v4 = vadd.f32 %v438_v57, %v170_v52  ;;  %v1983_v5 = vld [vmem:[#allocation5 + $0x1a8] sm:$0xff]  ;;  %v1985_v6 = vld [vmem:[#allocation2 + $0x1a0] sm:$0xff]  ;;  %v372_v7 = vadd.f32 %v110_v1, %v109_v0  ;;  %v1987_v9 = vld [vmem:[#allocation5 + $0x1b0] sm:$0xff] }
  0x54   :  { %577 = vadd.xlane.f32.xlu2 %v576_v60  ;;  %v432_v8 = vadd.f32 %v431_v61, %v164_v50  ;;  %v510_v10 = vadd.f32 %v509_v62, %v1977_v58  ;;  %v365_v11 = vadd.f32 %v364_v63, %v1979_v59  ;;  %v112_v12 = vld [vmem:[#allocation2 + $0x1d8] sm:$0xff]  ;;  %v173_v13 = vld [vmem:[#allocation2 + $0x3c0] sm:$0xff]  ;;  %v1991_v15 = vld [vmem:[#allocation2 + $0x1a8] sm:$0xff] }
  0x55   :  { %505 = vadd.xlane.f32.xlu1 %v504_v44  ;;  %v440_v14 = vadd.f32 %v439_v4, %v171_v56  ;;  %v373_v16 = vadd.f32 %v372_v7, %v111_v2  ;;  %v174_v17 = vld [vmem:[#allocation2 + $0x3c8] sm:$0xff]  ;;  %v175_v18 = vld [vmem:[#allocation2 + $0x3d0] sm:$0xff]  ;;  %v1993_v19 = vld [vmem:[#allocation5 + $0x1b8] sm:$0xff] }
  0x56   :  { %433 = vadd.xlane.f32.xlu0 %v432_v8  ;;  %v511_v20 = vadd.f32 %v510_v10, %v1983_v5  ;;  %v1996_v21 = vld [vmem:[#allocation2 + $0x1b0] sm:$0xff]  ;;  %v366_v22 = vadd.f32 %v365_v11, %v1985_v6  ;;  %v113_v23 = vld [vmem:[#allocation2 + $0x1e0] sm:$0xff]  ;;  %v444_v24 = vadd.f32 %v174_v17, %v173_v13  ;;  %v176_v27 = vld [vmem:[#allocation2 + $0x3d8] sm:$0xff] }
  0x57   :  { %v441_v25 = vadd.f32 %v440_v14, %v172_v3  ;;  %v374_v26 = vadd.f32 %v373_v16, %v112_v12  ;;  %v293_v28 = vld [vmem:[#allocation5 + $0x380] sm:$0xff]  ;;  %v294_v29 = vld [vmem:[#allocation5 + $0x388] sm:$0xff]  ;;  %v2000_v31 = vld [vmem:[#allocation2 + $0x1b8] sm:$0xff] }
  0x58   :  { %v512_v30 = vadd.f32 %v511_v20, %v1987_v9  ;;  %v367_v33 = vadd.f32 %v366_v22, %v1991_v15  ;;  %v114_v34 = vld [vmem:[#allocation2 + $0x1e8] sm:$0xff]  ;;  %v445_v35 = vadd.f32 %v444_v24, %v175_v18  ;;  %v295_v38 = vld [vmem:[#allocation5 + $0x390] sm:$0xff]  ;;  %v579_v39 = vadd.f32 %v294_v29, %v293_v28  ;;  %v177_v42 = vld [vmem:[#allocation2 + $0x3e0] sm:$0xff] }
  0x59   :  { %v115_v40 = vld [vmem:[#allocation2 + $0x1f0] sm:$0xff]  ;;  %v375_v41 = vadd.f32 %v374_v26, %v113_v23  ;;  %v296_v43 = vld [vmem:[#allocation5 + $0x398] sm:$0xff]  ;;  %v301_v51 = vld [vmem:[#allocation5 + $0x3c0] sm:$0xff] }
  0x5a   :  { %v513_v44 = vadd.f32 %v512_v30, %v1993_v19  ;;  %v368_v45 = vadd.f32 %v367_v33, %v1996_v21  ;;  %v446_v49 = vadd.f32 %v445_v35, %v176_v27  ;;  %v580_v50 = vadd.f32 %v579_v39, %v295_v38  ;;  %v302_v52 = vld [vmem:[#allocation5 + $0x3c8] sm:$0xff]  ;;  %v303_v53 = vld [vmem:[#allocation5 + $0x3d0] sm:$0xff]  ;;  %v116_v55 = vld [vmem:[#allocation2 + $0x1f8] sm:$0xff] }
  0x5b   :  { %v376_v56 = vadd.f32 %v375_v41, %v114_v34  ;;  %v178_v57 = vld [vmem:[#allocation2 + $0x3e8] sm:$0xff]  ;;  %v297_v60 = vld [vmem:[#allocation5 + $0x3a0] sm:$0xff]  ;;  %v588_v61 = vadd.f32 %v302_v52, %v301_v51  ;;  %v179_v63 = vld [vmem:[#allocation2 + $0x3f0] sm:$0xff] }
  0x5c   :  { %514 = vadd.xlane.f32.xlu2 %v513_v44  ;;  %v369_v62 = vadd.f32 %v368_v45, %v2000_v31  ;;  %v447_v0 = vadd.f32 %v446_v49, %v177_v42  ;;  %v581_v1 = vadd.f32 %v580_v50, %v296_v43  ;;  %v304_v2 = vld [vmem:[#allocation5 + $0x3d8] sm:$0xff]  ;;  %v237_v3 = vld [vmem:[#allocation5 + $0x1c0] sm:$0xff]  ;;  %v298_v7 = vld [vmem:[#allocation5 + $0x3a8] sm:$0xff] }
  0x5d   :  { %442 = vadd.xlane.f32.xlu1 %v441_v25  ;;  %v377_v4 = vadd.f32 %v376_v56, %v115_v40  ;;  %v589_v8 = vadd.f32 %v588_v61, %v303_v53  ;;  %v238_v10 = vld [vmem:[#allocation5 + $0x1c8] sm:$0xff]  ;;  %v239_v11 = vld [vmem:[#allocation5 + $0x1d0] sm:$0xff]  ;;  %v305_v14 = vld [vmem:[#allocation5 + $0x3e0] sm:$0xff] }
  0x5e   :  { %370 = vadd.xlane.f32.xlu0 %v369_v62  ;;  %v448_v12 = vadd.f32 %v447_v0, %v178_v57  ;;  %v582_v13 = vadd.f32 %v581_v1, %v297_v60  ;;  %v516_v16 = vadd.f32 %v238_v10, %v237_v3  ;;  %v180_v17 = vld [vmem:[#allocation2 + $0x3f8] sm:$0xff]  ;;  %v299_v18 = vld [vmem:[#allocation5 + $0x3b0] sm:$0xff]  ;;  %v306_v26 = vld [vmem:[#allocation5 + $0x3e8] sm:$0xff] }
  0x5f   :  { %v590_v20 = vadd.f32 %v589_v8, %v304_v2  ;;  %v240_v22 = vld [vmem:[#allocation5 + $0x1d8] sm:$0xff]  ;;  %v378_v23 = vadd.f32 %v377_v4, %v116_v55  ;;  %v241_v30 = vld [vmem:[#allocation5 + $0x1e0] sm:$0xff]  ;;  %v307_v35 = vld [vmem:[#allocation5 + $0x3f0] sm:$0xff]  ;;  %v629_v55 = vlaneseq }
  0x60   :  { %v449_v24 = vadd.f32 %v448_v12, %v179_v63  ;;  %v583_v25 = vadd.f32 %v582_v13, %v298_v7  ;;  %v517_v27 = vadd.f32 %v516_v16, %v239_v11  ;;  %v300_v28 = vld [vmem:[#allocation5 + $0x3b8] sm:$0xff]  ;;  %v242_v40 = vld [vmem:[#allocation5 + $0x1e8] sm:$0xff]  ;;  %v243_v45 = vld [vmem:[#allocation5 + $0x1f0] sm:$0xff] }
  0x61   :  { %v591_v29 = vadd.f32 %v590_v20, %v305_v14  ;;  %v308_v43 = vld [vmem:[#allocation5 + $0x3f8] sm:$0xff]  ;;  %v2007_v57 = vand.u32 127, %v629_v55  ;;  %v603_v16 = vld [vmem:[%s2417_s2 + $0x30] sm:$0xff] }
  0x62   :  { %v450_v33 = vadd.f32 %v449_v24, %v180_v17  ;;  %v584_v34 = vadd.f32 %v583_v25, %v299_v18  ;;  %v518_v38 = vadd.f32 %v517_v27, %v240_v22  ;;  %v244_v50 = vld [vmem:[#allocation5 + $0x1f8] sm:$0xff]  ;;  %v602_v22 = vld [vmem:[%s2417_s2 + $0x28] sm:$0xff]  ;;  %v599_v27 = vld [vmem:[%s2417_s2 + $0x10] sm:$0xff] }
  0x63   :  { %v592_v39 = vadd.f32 %v591_v29, %v306_v26  ;;  %v2014_v62 = vadd.s32 4294967288, %v2007_v57  ;;  %v604_v14 = vld [vmem:[%s2417_s2 + $0x38] sm:$0xff]  ;;  %v611_v26 = vld [vmem:[%s2418_s3 + $0x30] sm:$0xff] }
  0x64   :  { %451 = vadd.xlane.f32.xlu2 %v450_v33  ;;  %v585_v41 = vadd.f32 %v584_v34, %v300_v28  ;;  %v519_v42 = vadd.f32 %v518_v38, %v241_v30  ;;  %757 = vmatpush.msra.mxu1 %v604_v14  ;;  %v612_v24 = vld [vmem:[%s2418_s3 + $0x38] sm:$0xff]  ;;  %v610_v33 = vld [vmem:[%s2418_s3 + $0x28] sm:$0xff]  ;;  %v597_v38 = vld [vmem:[%s2417_s2] sm:$0xff] }
  0x65   :  { %379 = vadd.xlane.f32.xlu1 %v378_v23  ;;  %v593_v44 = vadd.f32 %v592_v39, %v307_v35  ;;  %v601_v23 = vld [vmem:[%s2417_s2 + $0x20] sm:$0xff]  ;;  %v600_v25 = vld [vmem:[%s2417_s2 + $0x18] sm:$0xff]  ;;  %688 = vmatpush.msra.mxu0 %v612_v24  ;;  %v598_v34 = vld [vmem:[%s2417_s2 + $0x8] sm:$0xff]  ;;  %v2132_v24 = vadd.s32 4294967248, %v2007_v57 }
  0x66   :  { %586 = vadd.xlane.f32.xlu0 %v585_v41  ;;  %v520_v49 = vadd.f32 %v519_v42, %v242_v40  ;;  %758 = vmatpush.msra.mxu1 %v603_v16  ;;  %v609_v35 = vld [vmem:[%s2418_s3 + $0x20] sm:$0xff]  ;;  %v608_v39 = vld [vmem:[%s2418_s3 + $0x18] sm:$0xff]  ;;  %v607_v40 = vld [vmem:[%s2418_s3 + $0x10] sm:$0xff] }
  0x67   :  { %v594_v51 = vadd.f32 %v593_v44, %v308_v43  ;;  %689 = vmatpush.msra.mxu0 %v611_v26  ;;  %v606_v44 = vld [vmem:[%s2418_s3 + $0x8] sm:$0xff] }
  0x68   :  { %v521_v52 = vadd.f32 %v520_v49, %v243_v45  ;;  %759 = vmatpush.msra.mxu1 %v602_v22  ;;  %v605_v45 = vld [vmem:[%s2418_s3] sm:$0xff] }
  0x69   :  { %690 = vmatpush.msra.mxu0 %v610_v33 }
  0x6a   :  { %v522_v53 = vadd.f32 %v521_v52, %v244_v50  ;;  %760 = vmatpush.msra.mxu1 %v601_v23  ;;  %v2106_v52 = vadd.s32 4294967280, %v2007_v57 }
  0x6b   :  { %691 = vmatpush.msra.mxu0 %v609_v35 }
  0x6c   :  { %761 = vmatpush.msra.mxu1 %v600_v25 }
  0x6d   :  { %595 = vadd.xlane.f32.xlu1 %v594_v51  ;;  %692 = vmatpush.msra.mxu0 %v608_v39 }
  0x6e   :  { %523 = vadd.xlane.f32.xlu0 %v522_v53  ;;  %762 = vmatpush.msra.mxu1 %v599_v27 }
  0x6f   :  { %693 = vmatpush.msra.mxu0 %v607_v40 }
  0x70   :  { %763 = vmatpush.msra.mxu1 %v598_v34 }
  0x71   :  { %694 = vmatpush.msra.mxu0 %v606_v44 }
  0x72   :  { %764 = vmatpush.msra.mxu1 %v597_v38 }
  0x73   :  { %695 = vmatpush.msra.mxu0 %v605_v45 }
  0x8e   :  { %v461_v56 = vpop.xlane.xlu2 %460 }
  0x8f   :  { %v631_v63 = vperm.slane %v461_v56, %v2007_v57  ;;  %v2111_v56 = vadd.s32 4294967272, %v2007_v57 }
  0x90   :  { %v2009_v60 = vpop.xlane.xlu1 %388 }
  0x91   :  { %v2011_v61 = vpop.xlane.xlu0 %316  ;;  %v731_v16 = vperm.slane %v2009_v60, %v2007_v57 }
  0x92   :  { %v716_v23 = vperm.slane %v2011_v61, %v2007_v57 }
  0x96   :  { %v470_v0 = vpop.xlane.xlu2 %469 }
  0x97   :  { %v633_v1 = vperm.slane %v470_v0, %v2014_v62  ;;  %v2116_v0 = vadd.s32 4294967264, %v2007_v57 }
  0x98   :  { %v2021_v3 = vpop.xlane.xlu1 %397 }
  0x99   :  { %v2019_v2 = vsel %vm634_vm0, %v633_v1, %v631_v63  ;;  %v2023_v4 = vpop.xlane.xlu0 %325  ;;  %v732_v53 = vperm.slane %v2021_v3, %v2014_v62  ;;  %v2125_v3 = vadd.s32 4294967256, %v2007_v57 }
  0x9a   :  { %v717_v63 = vperm.slane %v2023_v4, %v2014_v62 }
  0x9b   :  { %v733_v60 = vsel %vm634_vm0, %v732_v53, %v731_v16 }
  0x9c   :  { %v718_v27 = vsel %vm634_vm0, %v717_v63, %v716_v23 }
  0x9f   :  { %v2027_v8 = vpop.xlane.xlu2 %334 }
  0xa0   :  { %v2025_v7 = vpop.xlane.xlu1 %541  ;;  %v719_v22 = vperm.slane %v2027_v8, %v2106_v52 }
  0xa1   :  { %v2029_v10 = vpop.xlane.xlu0 %532  ;;  %v661_v61 = vperm.slane %v2025_v7, %v2014_v62 }
  0xa2   :  { %v720_v34 = vsel %vm638_vm1, %v719_v22, %v718_v27  ;;  %v660_v7 = vperm.slane %v2029_v10, %v2007_v57 }
  0xa7   :  { %v2033_v12 = vpop.xlane.xlu2 %550 }
  0xa8   :  { %v2031_v11 = vpop.xlane.xlu1 %478 }
  0xa9   :  { %v2035_v13 = vpop.xlane.xlu0 %406 }
  0xaa   :  { %v734_v4 = vperm.slane %v2035_v13, %v2106_v52 }
  0xac   :  { %v735_v38 = vsel %vm638_vm1, %v734_v4, %v733_v60  ;;  %v637_v60 = vperm.slane %v2031_v11, %v2106_v52 }
  0xaf   :  { %v2045_v18 = vpop.xlane.xlu2 %487 }
  0xb0   :  { %v2043_v17 = vpop.xlane.xlu1 %415  ;;  %v641_v27 = vperm.slane %v2045_v18, %v2111_v56  ;;  %v639_v18 = vsel %vm638_vm1, %v637_v60, %v2019_v2 }
  0xb1   :  { %v2047_v20 = vpop.xlane.xlu0 %343  ;;  %v736_v26 = vperm.slane %v2043_v17, %v2111_v56 }
  0xb2   :  { %v721_v8 = vperm.slane %v2047_v20, %v2111_v56  ;;  %v656_v20 = vadd.s32 4294967240, %v2007_v57  ;;  %v663_v57 = vperm.slane %v2033_v12, %v2106_v52 }
  0xb7   :  { %v2069_v29 = vpop.xlane.xlu2 %424 }
  0xb8   :  { %v2067_v28 = vpop.xlane.xlu1 %352  ;;  %v738_v33 = vperm.slane %v2069_v29, %v2116_v0  ;;  %v722_v29 = vsel %vm642_vm2, %v721_v8, %v720_v34  ;;  %v662_v8 = vsel %vm634_vm0, %v661_v61, %v660_v7  ;;  %v643_v34 = vsel %vm642_vm2, %v641_v27, %v639_v18  ;;  %v770_v7 = vld [vmem:[%s2419_s4] sm:$0xff] }
  0xb9   :  { %v2071_v30 = vpop.xlane.xlu0 %559  ;;  %v723_v13 = vperm.slane %v2067_v28, %v2116_v0  ;;  %v737_v28 = vsel %vm642_vm2, %v736_v26, %v735_v38 }
  0xba   :  { %v665_v23 = vperm.slane %v2071_v30, %v2111_v56 }
  0xbb   :  { %v724_v40 = vsel %vm646_vm3, %v723_v13, %v722_v29  ;;  %v664_v13 = vsel %vm638_vm1, %v663_v57, %v662_v8 }
  0xbf   :  { %v362_v42 = vpop.xlane.xlu2 %361 }
  0xc0   :  { %v2091_v41 = vpop.xlane.xlu1 %568  ;;  %v725_v35 = vperm.slane %v362_v42, %v2125_v3  ;;  %v739_v42 = vsel %vm646_vm3, %v738_v33, %v737_v28 }
  0xc1   :  { %v2093_v43 = vpop.xlane.xlu0 %496  ;;  %v667_v26 = vperm.slane %v2091_v41, %v2116_v0  ;;  %v666_v41 = vsel %vm642_vm2, %v665_v23, %v664_v13 }
  0xc2   :  { %v645_v11 = vperm.slane %v2093_v43, %v2116_v0 }
  0xc3   :  { %v668_v56 = vsel %vm646_vm3, %v667_v26, %v666_v41 }
  0xc7   :  { %v2103_v50 = vpop.xlane.xlu2 %577 }
  0xc8   :  { %v2101_v49 = vpop.xlane.xlu1 %505  ;;  %v669_v30 = vperm.slane %v2103_v50, %v2125_v3 }
  0xc9   :  { %v434_v51 = vpop.xlane.xlu0 %433  ;;  %v649_v61 = vperm.slane %v2101_v49, %v2125_v3 }
  0xca   :  { %v740_v17 = vperm.slane %v434_v51, %v2125_v3  ;;  %v726_v51 = vsel %vm650_vm4, %v725_v35, %v724_v40  ;;  %v670_v43 = vsel %vm650_vm4, %v669_v30, %v668_v56  ;;  %v647_v35 = vsel %vm646_vm3, %v645_v11, %v643_v34 }
  0xcb   :  { %v651_v49 = vsel %vm650_vm4, %v649_v61, %v647_v35 }
  0xcc   :  { %v741_v53 = vsel %vm650_vm4, %v740_v17, %v739_v42 }
  0xcf   :  { %v2118_v14 = vpop.xlane.xlu2 %514 }
  0xd0   :  { %v443_v1 = vpop.xlane.xlu1 %442  ;;  %v653_v50 = vperm.slane %v2118_v14, %v2132_v24 }
  0xd1   :  { %v371_v25 = vpop.xlane.xlu0 %370  ;;  %v742_v39 = vperm.slane %v443_v1, %v2132_v24 }
  0xd2   :  { %v727_v62 = vperm.slane %v371_v25, %v2132_v24 }
  0xd3   :  { %v743_v10 = vsel %vm654_vm5, %v742_v39, %v741_v53  ;;  %v655_v39 = vsel %vm654_vm5, %v653_v50, %v651_v49 }
  0xd4   :  { %v728_v16 = vsel %vm654_vm5, %v727_v62, %v726_v51  ;;  %v771_v62 = vld [vmem:[%s2419_s4 + $0x8] sm:$0xff]  ;;  %s1915_s4 = smov [#allocation7]  }
  0xd5   :  { %790 = vmatpush.msra.mxu2 %v771_v62  ;;  %v1595_v62 = vld [vmem:[#allocation2 + $0x50] sm:$0xff]  ;;  %s1532_s12 = sshll.u32 %s1915_s4, 4  ;;  %s1533_s12 = int_to_ptr.vmem [resolvable:$true] %s1532_s12 }
  0xd7   :  { %v452_v45 = vpop.xlane.xlu2 %451  ;;  %791 = vmatpush.msra.mxu2 %v770_v7 }
  0xd8   :  { %v380_v44 = vpop.xlane.xlu1 %379  ;;  %v744_v1 = vperm.slane %v452_v45, %v656_v20 }
  0xd9   :  { %v729_v63 = vperm.slane %v380_v44, %v656_v20  ;;  %v587_v22 = vpop.xlane.xlu0 %586  ;;  %v822_v44 = vshrl.u32 %v629_v55, 7 }
  0xda   :  { %v745_v25 = vsel %vm658_vm6, %v744_v1, %v743_v10  ;;  %v671_v52 = vperm.slane %v587_v22, %v2132_v24 }
  0xdb   :  { %v730_v4 = vsel %vm658_vm6, %v729_v63, %v728_v16  ;;  %v2210_v45 = vadd.s32 80, %v822_v44  ;;  %v2212_v51 = vadd.s32 72, %v822_v44  ;;  %v2214_v53 = vadd.s32 64, %v822_v44 }
  0xdc   :  { %v746_v12 = vsel %vm675_vm7, %v745_v25, %v730_v4  ;;  %v672_v17 = vsel %vm654_vm5, %v671_v52, %v670_v43  ;;  %v841_v13 = vadd.s32 88, %v822_v44  ;;  %v2219_v11 = vadd.s32 96, %v822_v44 }
  0xdd   :  { %1549 = vmatmul.msk.f32.vlgmr.msra.gmra.mxu1 %vm677_vm8, %v746_v12  ;;  %1558 = vset.pattern.permute.xlu2 %v2210_v45  ;;  %v2221_v52 = vadd.s32 120, %v822_v44  ;;  %v2225_v41 = vadd.s32 104, %v822_v44  ;;  %v2227_v61 = vadd.s32 112, %v822_v44 }
  0xde   :  { %1557 = vset.pattern.permute.xlu1 %v2212_v51  ;;  %1556 = vset.pattern.permute.xlu0 %v2214_v53 }
  0xe0   :  { %v596_v33 = vpop.xlane.xlu1 %595 }
  0xe1   :  { %v673_v0 = vperm.slane %v596_v33, %v656_v20  ;;  %v524_v38 = vpop.xlane.xlu0 %523 }
  0xe2   :  { %v657_v3 = vperm.slane %v524_v38, %v656_v20 }
  0xe3   :  { %v674_v2 = vsel %vm658_vm6, %v673_v0, %v672_v17 }
  0xe4   :  { %v659_v14 = vsel %vm658_vm6, %v657_v3, %v655_v39 }
  0xe5   :  { %v676_v24 = vsel %vm675_vm7, %v674_v2, %v659_v14  ;;  %v1593_v2 = vld [vmem:[#allocation2 + $0x40] sm:$0xff]  ;;  %v1594_v14 = vld [vmem:[#allocation2 + $0x48] sm:$0xff] }
  0xe6   :  { %1548 = vmatmul.msk.f32.vlgmr.msra.gmra.mxu0 %vm677_vm8, %v676_v24 }
 0x15a   :  { %v766_v20 = vpop.f32.mrf.mxu1 }
 0x163   :  { %v697_v28 = vpop.f32.mrf.mxu0 }
 0x164   :  { %v767_v29 = vadd.f32 %v766_v20, %v697_v28  ;;  %v1596_v20 = vld [vmem:[#allocation5 + $0x40] sm:$0xff] }
 0x166   :  { %v769_v40 = vmax.f32 %v767_v29, 0.0  ;;  %v1597_v29 = vld [vmem:[#allocation5 + $0x48] sm:$0xff] }
 0x168   :  { %1550 = vmatmul.msk.f32.vlgmr.msra.gmra.mxu2 %vm772_vm9, %v769_v40 }
 0x1eb   :  { %v793_v42 = vpop.f32.mrf.mxu2 }
 0x1ec   :  { %797 = vrot.lane.b32.xlu2 %v793_v42, %s1913_s27 }
 0x246   :  { %v798_v63 = vpop.permute.xlu2 %797 }
 0x247   :  { %v800_v1 = vsub.f32 %v793_v42, %v798_v63  ;;  %v1598_v42 = vld [vmem:[#allocation5 + $0x50] sm:$0xff] }
 0x249   :  { %v801_v57 = vmul.f32 1.442695, %v800_v1  ;;  %v1601_v1 = vld [vmem:[#allocation2 + $0x60] sm:$0xff] }
 0x24b   :  { %1589 = vpow2.f32 %v801_v57 }
 0x251   :  { %v1590_v10 = vpop.eup %1589 }
 0x252   :  { %v803_v16 = vadd.f32 1.0, %v1590_v10  ;;  %v1602_v10 = vld [vmem:[#allocation5 + $0x60] sm:$0xff] }
 0x254   :  { %1591 = vrcp.f32 %v803_v16  ;;  %v815_v4 = vand.u32 2147483648, %v803_v16  ;;  %v813_v60 = vand.u32 2147483647, %v803_v16  ;;  %vm809_vm11 = vweird.f32 %v803_v16 }
 0x256   :  { %v816_v12 = vor.u32 1.1754944e-38, %v815_v4  ;;  %vm814_vm13 = vcmp.eq.f32.partialorder %v813_v60, 8.507059e+37 }
 0x25a   :  { %v1592_v55 = vpop.eup %1591 }
 0x25b   :  { %v805_v22 = vmul.f32 %v1592_v55, %v803_v16  ;;  %vm810_vm10 = vweird.f32 %v1592_v55 }
 0x25c   :  { %vm811_vm12 = vmor %vm809_vm11, %vm810_vm10 }
 0x25d   :  { %v806_v23 = vsub.f32 1.0, %v805_v22 }
 0x25f   :  { %v807_v25 = vmul.f32 %v1592_v55, %v806_v23  ;;  %v1604_v23 = vld [vmem:[#allocation5 + $0x70] sm:$0xff] }
 0x261   :  { %v808_v26 = vadd.f32 %v1592_v55, %v807_v25 }
 0x263   :  { %v812_v8 = vsel %vm811_vm12, %v1592_v55, %v808_v26  ;;  %v1603_v55 = vld [vmem:[#allocation5 + $0x68] sm:$0xff] }
 0x264   :  { %v817_v27 = vsel %vm814_vm13, %v816_v12, %v812_v8  ;;  %v1605_v12 = vld [vmem:[#allocation2 + $0x68] sm:$0xff] }
 0x265   :  { %v820_v30 = vperm.slane %v817_v27, 0  ;;  %v869_v18 = vperm.slane %v817_v27, 1  ;;  %v819_v56 = vsub.f32 1.0, %v817_v27 }
 0x267   :  { %837 = vperm.xlu2 %1558, %v820_v30   ;;  %831 = vperm.xlu1 %1557, %v820_v30   ;;  %v918_v50 = vperm.slane %v819_v56, 0  ;;  %v2239_v33 = vperm.slane %v819_v56, 1  ;;  %v1607_v56 = vld [vmem:[#allocation2 + $0x70] sm:$0xff] }
 0x268   :  { %825 = vperm.xlu0 %1556, %v820_v30  }
 0x26f   :  { %1559 = vset.pattern.permute.xlu2 %v841_v13  ;;  %1560 = vset.pattern.permute.xlu1 %v2219_v11 }
 0x270   :  { %1563 = vset.pattern.permute.xlu0 %v2221_v52 }
 0x277   :  { %843 = vperm.xlu2 %1559, %v820_v30   ;;  %849 = vperm.xlu1 %1560, %v820_v30  }
 0x278   :  { %867 = vperm.xlu0 %1563, %v820_v30  }
 0x27f   :  { %1561 = vset.pattern.permute.xlu2 %v2225_v41  ;;  %1562 = vset.pattern.permute.xlu1 %v2227_v61 }
 0x280   :  { %1568 = vset.pattern.permute.xlu0 %v2219_v11 }
 0x287   :  { %855 = vperm.xlu2 %1561, %v820_v30   ;;  %861 = vperm.xlu1 %1562, %v820_v30   ;;  %v1606_v30 = vld [vmem:[#allocation5 + $0x78] sm:$0xff] }
 0x288   :  { %898 = vperm.xlu0 %1568, %v869_v18  }
 0x28f   :  { %1564 = vset.pattern.permute.xlu2 %v2214_v53  ;;  %1565 = vset.pattern.permute.xlu1 %v2212_v51 }
 0x290   :  { %1573 = vset.pattern.permute.xlu0 %v2212_v51 }
 0x297   :  { %874 = vperm.xlu2 %1564, %v869_v18   ;;  %880 = vperm.xlu1 %1565, %v869_v18  }
 0x298   :  { %929 = vperm.xlu0 %1573, %v918_v50  }
 0x29f   :  { %1566 = vset.pattern.permute.xlu2 %v2210_v45  ;;  %1567 = vset.pattern.permute.xlu1 %v841_v13 }
 0x2a0   :  { %1578 = vset.pattern.permute.xlu0 %v2227_v61 }
 0x2a7   :  { %886 = vperm.xlu2 %1566, %v869_v18   ;;  %892 = vperm.xlu1 %1567, %v869_v18  }
 0x2a8   :  { %959 = vperm.xlu0 %1578, %v918_v50  }
 0x2af   :  { %1569 = vset.pattern.permute.xlu2 %v2225_v41  ;;  %1570 = vset.pattern.permute.xlu1 %v2227_v61 }
 0x2b0   :  { %1583 = vset.pattern.permute.xlu0 %v841_v13 }
 0x2b7   :  { %904 = vperm.xlu2 %1569, %v869_v18   ;;  %910 = vperm.xlu1 %1570, %v869_v18  }
 0x2b8   :  { %990 = vperm.xlu0 %1583, %v2239_v33  }
 0x2bf   :  { %1571 = vset.pattern.permute.xlu2 %v2221_v52  ;;  %1572 = vset.pattern.permute.xlu1 %v2214_v53 }
 0x2c0   :  { %1588 = vset.pattern.permute.xlu0 %v2221_v52 }
 0x2c1   :  { %v2253_v43 = vpop.permute.xlu2 %837 }
 0x2c7   :  { %916 = vperm.xlu2 %1571, %v869_v18   ;;  %923 = vperm.xlu1 %1572, %v918_v50  }
 0x2cf   :  { %1574 = vset.pattern.permute.xlu2 %v2210_v45  ;;  %1575 = vset.pattern.permute.xlu1 %v841_v13 }
 0x2d1   :  { %v2259_v35 = vpop.permute.xlu2 %843 }
 0x2d7   :  { %935 = vperm.xlu2 %1574, %v918_v50   ;;  %941 = vperm.xlu1 %1575, %v918_v50  }
 0x2d9   :  { %v832_v38 = vpop.permute.xlu1 %831 }
 0x2da   :  { %v2250_v34 = vpop.permute.xlu0 %825  ;;  %v1024_v39 = vmul.f32 %v1593_v2, %v832_v38  ;;  %v1025_v24 = vmul.f32 %v1594_v14, %v832_v38  ;;  %v1026_v7 = vmul.f32 %v1595_v62, %v832_v38  ;;  %v1028_v57 = vmul.f32 %v1601_v1, %v832_v38  ;;  %v1608_v14 = vld [vmem:[#allocation2 + $0x78] sm:$0xff] }
 0x2db   :  { %v1029_v8 = vmul.f32 %v1605_v12, %v832_v38  ;;  %v1031_v62 = vmul.f32 %v1608_v14, %v832_v38  ;;  %v1614_v12 = vld [vmem:[#allocation5 + $0x2c8] sm:$0xff] }
 0x2df   :  { %1576 = vset.pattern.permute.xlu2 %v2219_v11  ;;  %1577 = vset.pattern.permute.xlu1 %v2225_v41 }
 0x2e1   :  { %v2265_v49 = vpop.permute.xlu2 %855 }
 0x2e7   :  { %947 = vperm.xlu2 %1576, %v918_v50   ;;  %953 = vperm.xlu1 %1577, %v918_v50  }
 0x2e9   :  { %v2267_v27 = vpop.permute.xlu1 %849 }
 0x2ea   :  { %v2255_v0 = vpop.permute.xlu0 %867 }
 0x2ef   :  { %1579 = vset.pattern.permute.xlu2 %v2221_v52  ;;  %1580 = vset.pattern.permute.xlu1 %v2214_v53  ;;  %v1600_v53 = vld [vmem:[#allocation2 + $0x58] sm:$0xff] }
 0x2f0   :  { %v1027_v63 = vmul.f32 %v1600_v53, %v832_v38 }
 0x2f7   :  { %965 = vperm.xlu2 %1579, %v918_v50   ;;  %972 = vperm.xlu1 %1580, %v2239_v33   ;;  %v1030_v50 = vmul.f32 %v1607_v56, %v832_v38 }
 0x2fa   :  { %v2261_v17 = vpop.permute.xlu0 %898 }
 0x2ff   :  { %1581 = vset.pattern.permute.xlu2 %v2212_v51  ;;  %1582 = vset.pattern.permute.xlu1 %v2210_v45  ;;  %v1599_v45 = vld [vmem:[#allocation5 + $0x58] sm:$0xff] }
 0x307   :  { %978 = vperm.xlu2 %1581, %v2239_v33   ;;  %984 = vperm.xlu1 %1582, %v2239_v33  }
 0x30a   :  { %v930_v3 = vpop.permute.xlu0 %929 }
 0x30b   :  { %v1152_v28 = vmul.f32 %v1596_v20, %v930_v3  ;;  %v1153_v40 = vmul.f32 %v1597_v29, %v930_v3  ;;  %v1154_v44 = vmul.f32 %v1598_v42, %v930_v3  ;;  %v1155_v51 = vmul.f32 %v1599_v45, %v930_v3 }
 0x30c   :  { %v1156_v16 = vmul.f32 %v1602_v10, %v930_v3  ;;  %v1157_v22 = vmul.f32 %v1603_v55, %v930_v3  ;;  %v1158_v4 = vmul.f32 %v1604_v23, %v930_v3  ;;  %v1159_v13 = vmul.f32 %v1606_v30, %v930_v3  ;;  %v1611_v55 = vld [vmem:[#allocation2 + $0x2d0] sm:$0xff]  ;;  %v1612_v23 = vld [vmem:[#allocation2 + $0x2d8] sm:$0xff] }
 0x30d   :  { %v1280_v25 = vadd.f32 %v1152_v28, %v1024_v39  ;;  %v1281_v60 = vadd.f32 %v1153_v40, %v1025_v24  ;;  %v1282_v26 = vadd.f32 %v1154_v44, %v1026_v7  ;;  %v1283_v18 = vadd.f32 %v1155_v51, %v1027_v63  ;;  %v2271_v39 = vpop.permute.xlu2 %874  ;;  %v1615_v30 = vld [vmem:[#allocation5 + $0x2d0] sm:$0xff] }
 0x30e   :  { %v1284_v2 = vadd.f32 %v1156_v16, %v1028_v57  ;;  %v1285_v24 = vadd.f32 %v1157_v22, %v1029_v8  ;;  %v1286_v7 = vadd.f32 %v1158_v4, %v1030_v50  ;;  %v1287_v20 = vadd.f32 %v1159_v13, %v1031_v62  ;;  %v1619_v62 = vld [vmem:[#allocation5 + $0x2e8] sm:$0xff] }
 0x30f   :  { %1584 = vset.pattern.permute.xlu2 %v2219_v11  ;;  %1408 = vst [vmem:[#allocation7 + $0x40] sm:$0xff] %v1280_v25  ;;  %1585 = vset.pattern.permute.xlu1 %v2225_v41  ;;  %v862_v11 = vpop.permute.xlu1 %861 }
 0x310   :  { %1409 = vst [vmem:[#allocation7 + $0x48] sm:$0xff] %v1281_v60  ;;  %v1064_v38 = vmul.f32 %v862_v11, %v1968_v47  ;;  %v1065_v3 = vmul.f32 %v862_v11, %v1970_v48  ;;  %v1066_v28 = vmul.f32 %v862_v11, %v1973_v54  ;;  %v1067_v51 = vmul.f32 %v862_v11, %v1979_v59  ;;  %v1613_v60 = vld [vmem:[#allocation5 + $0x2c0] sm:$0xff] }
 0x311   :  { %1410 = vst [vmem:[#allocation7 + $0x50] sm:$0xff] %v1282_v26  ;;  %v1068_v53 = vmul.f32 %v862_v11, %v1985_v6 }
 0x312   :  { %1411 = vst [vmem:[#allocation7 + $0x58] sm:$0xff] %v1283_v18  ;;  %v1616_v18 = vld [vmem:[#allocation5 + $0x2d8] sm:$0xff] }
 0x313   :  { %1412 = vst [vmem:[#allocation7 + $0x60] sm:$0xff] %v1284_v2  ;;  %v1618_v2 = vld [vmem:[#allocation5 + $0x2e0] sm:$0xff] }
 0x314   :  { %1413 = vst [vmem:[#allocation7 + $0x68] sm:$0xff] %v1285_v24 }
 0x315   :  { %1414 = vst [vmem:[#allocation7 + $0x70] sm:$0xff] %v1286_v7  ;;  %v2275_v41 = vpop.permute.xlu2 %886  ;;  %v1620_v7 = vld [vmem:[#allocation5 + $0x2f0] sm:$0xff] }
 0x316   :  { %1415 = vst [vmem:[#allocation7 + $0x78] sm:$0xff] %v1287_v20 }
 0x317   :  { %996 = vperm.xlu2 %1584, %v2239_v33   ;;  %1002 = vperm.xlu1 %1585, %v2239_v33   ;;  %v2292_v10 = vpop.permute.xlu1 %880 }
 0x31a   :  { %v960_v29 = vpop.permute.xlu0 %959 }
 0x31b   :  { %v1192_v40 = vmul.f32 %v960_v29, %v1958_v32  ;;  %v1193_v42 = vmul.f32 %v960_v29, %v1960_v36  ;;  %v1194_v44 = vmul.f32 %v960_v29, %v1962_v37  ;;  %v1195_v45 = vmul.f32 %v960_v29, %v1966_v46 }
 0x31c   :  { %v1196_v63 = vmul.f32 %v960_v29, %v1977_v58  ;;  %v1197_v47 = vmul.f32 %v960_v29, %v1983_v5  ;;  %v1198_v48 = vmul.f32 %v960_v29, %v1987_v9  ;;  %v1069_v32 = vmul.f32 %v862_v11, %v1991_v15 }
 0x31d   :  { %v1320_v54 = vadd.f32 %v1192_v40, %v1064_v38  ;;  %v1321_v1 = vadd.f32 %v1193_v42, %v1065_v3  ;;  %v1322_v57 = vadd.f32 %v1194_v44, %v1066_v28  ;;  %v1199_v36 = vmul.f32 %v960_v29, %v1993_v19  ;;  %v2297_v6 = vpop.permute.xlu2 %904  ;;  %v1622_v40 = vld [vmem:[#allocation2 + $0x2e8] sm:$0xff] }
 0x31e   :  { %v1323_v37 = vadd.f32 %v1195_v45, %v1067_v51  ;;  %v1070_v46 = vmul.f32 %v862_v11, %v1996_v21  ;;  %v1324_v59 = vadd.f32 %v1196_v63, %v1068_v53  ;;  %v1071_v58 = vmul.f32 %v862_v11, %v2000_v31  ;;  %v1609_v31 = vld [vmem:[#allocation2 + $0x2c0] sm:$0xff]  ;;  %v1621_v11 = vld [vmem:[#allocation5 + $0x2f8] sm:$0xff]  ;;  %v1623_v45 = vld [vmem:[#allocation2 + $0x2f0] sm:$0xff] }
 0x31f   :  { %1448 = vst [vmem:[#allocation7 + $0x180] sm:$0xff] %v1320_v54  ;;  %1586 = vset.pattern.permute.xlu2 %v2227_v61  ;;  %v1325_v5 = vadd.f32 %v1197_v47, %v1069_v32  ;;  %1587 = vset.pattern.permute.xlu1 %v2221_v52  ;;  %v893_v19 = vpop.permute.xlu1 %892  ;;  %v1610_v52 = vld [vmem:[#allocation2 + $0x2c8] sm:$0xff]  ;;  %v1624_v53 = vld [vmem:[#allocation2 + $0x2f8] sm:$0xff]  ;;  %v1625_v54 = vld [vmem:[#allocation2 + $0x80] sm:$0xff] }
 0x320   :  { %1449 = vst [vmem:[#allocation7 + $0x188] sm:$0xff] %v1321_v1  ;;  %v1326_v9 = vadd.f32 %v1198_v48, %v1070_v46  ;;  %v1327_v15 = vadd.f32 %v1199_v36, %v1071_v58  ;;  %v1104_v61 = vmul.f32 %v1609_v31, %v893_v19  ;;  %v1105_v16 = vmul.f32 %v1610_v52, %v893_v19  ;;  %v1627_v58 = vld [vmem:[#allocation5 + $0x80] sm:$0xff] }
 0x321   :  { %1450 = vst [vmem:[#allocation7 + $0x190] sm:$0xff] %v1322_v57  ;;  %v1106_v22 = vmul.f32 %v1611_v55, %v893_v19  ;;  %v1107_v4 = vmul.f32 %v1612_v23, %v893_v19  ;;  %v1109_v42 = vmul.f32 %v1622_v40, %v893_v19  ;;  %v1110_v51 = vmul.f32 %v1623_v45, %v893_v19  ;;  %v1626_v57 = vld [vmem:[#allocation2 + $0x88] sm:$0xff] }
 0x322   :  { %1451 = vst [vmem:[#allocation7 + $0x198] sm:$0xff] %v1323_v37  ;;  %v1111_v63 = vmul.f32 %v1624_v53, %v893_v19  ;;  %v1032_v1 = vmul.f32 %v1625_v54, %v2253_v43  ;;  %v1033_v32 = vmul.f32 %v1626_v57, %v2253_v43  ;;  %v1646_v57 = vld [vmem:[#allocation5 + $0x18] sm:$0xff] }
 0x323   :  { %1452 = vst [vmem:[#allocation7 + $0x1a0] sm:$0xff] %v1324_v59 }
 0x324   :  { %1453 = vst [vmem:[#allocation7 + $0x1a8] sm:$0xff] %v1325_v5 }
 0x325   :  { %1454 = vst [vmem:[#allocation7 + $0x1b0] sm:$0xff] %v1326_v9  ;;  %v2301_v21 = vpop.permute.xlu2 %916  ;;  %v1628_v9 = vld [vmem:[#allocation5 + $0x88] sm:$0xff] }
 0x326   :  { %1455 = vst [vmem:[#allocation7 + $0x1b8] sm:$0xff] %v1327_v15 }
 0x327   :  { %1008 = vperm.xlu2 %1586, %v2239_v33   ;;  %1014 = vperm.xlu1 %1587, %v2239_v33   ;;  %v1617_v33 = vld [vmem:[#allocation2 + $0x2e0] sm:$0xff] }
 0x328   :  { %v1108_v50 = vmul.f32 %v1617_v33, %v893_v19  ;;  %v1629_v19 = vld [vmem:[#allocation5 + $0x90] sm:$0xff]  ;;  %v1637_v33 = vld [vmem:[#allocation5 + $0xb8] sm:$0xff] }
 0x329   :  { %v2305_v36 = vpop.permute.xlu1 %910 }
 0x32a   :  { %v991_v25 = vpop.permute.xlu0 %990 }
 0x32b   :  { %v1232_v26 = vmul.f32 %v1613_v60, %v991_v25  ;;  %v1233_v8 = vmul.f32 %v1614_v12, %v991_v25  ;;  %v1234_v13 = vmul.f32 %v1615_v30, %v991_v25  ;;  %v1235_v56 = vmul.f32 %v1616_v18, %v991_v25  ;;  %v1634_v60 = vld [vmem:[#allocation5 + $0xa8] sm:$0xff]  ;;  %v1635_v30 = vld [vmem:[#allocation2 + $0xa0] sm:$0xff]  ;;  %v1636_v18 = vld [vmem:[#allocation5 + $0xb0] sm:$0xff] }
 0x32c   :  { %v1236_v14 = vmul.f32 %v1618_v2, %v991_v25  ;;  %v1237_v24 = vmul.f32 %v1619_v62, %v991_v25  ;;  %v1238_v20 = vmul.f32 %v1620_v7, %v991_v25  ;;  %v1239_v38 = vmul.f32 %v1621_v11, %v991_v25  ;;  %v1639_v7 = vld [vmem:[#allocation2 + $0xb0] sm:$0xff]  ;;  %v1640_v11 = vld [vmem:[#allocation2 + $0xb8] sm:$0xff] }
 0x32d   :  { %v1360_v3 = vadd.f32 %v1232_v26, %v1104_v61  ;;  %v1361_v28 = vadd.f32 %v1233_v8, %v1105_v16  ;;  %v1362_v29 = vadd.f32 %v1234_v13, %v1106_v22  ;;  %v1363_v44 = vadd.f32 %v1235_v56, %v1107_v4  ;;  %v1630_v61 = vld [vmem:[#allocation5 + $0x98] sm:$0xff]  ;;  %v1631_v16 = vld [vmem:[#allocation2 + $0x90] sm:$0xff]  ;;  %v1632_v22 = vld [vmem:[#allocation5 + $0xa0] sm:$0xff] }
 0x32e   :  { %v1364_v47 = vadd.f32 %v1236_v14, %v1108_v50  ;;  %v1365_v48 = vadd.f32 %v1237_v24, %v1109_v42  ;;  %v1366_v37 = vadd.f32 %v1238_v20, %v1110_v51  ;;  %v1367_v46 = vadd.f32 %v1239_v38, %v1111_v63  ;;  %v1633_v4 = vld [vmem:[#allocation2 + $0x98] sm:$0xff]  ;;  %v1638_v14 = vld [vmem:[#allocation2 + $0xa8] sm:$0xff]  ;;  %v1643_v63 = vld [vmem:[#allocation5] sm:$0xff] }
 0x32f   :  { %1488 = vst [vmem:[#allocation7 + $0x2c0] sm:$0xff] %v1360_v3  ;;  %v1034_v55 = vmul.f32 %v1631_v16, %v2253_v43  ;;  %v1035_v25 = vmul.f32 %v1633_v4, %v2253_v43  ;;  %v1036_v13 = vmul.f32 %v1635_v30, %v2253_v43  ;;  %v1037_v62 = vmul.f32 %v1638_v14, %v2253_v43  ;;  %v1642_v42 = vld [vmem:[#allocation2 + $0x8] sm:$0xff] }
 0x330   :  { %1489 = vst [vmem:[#allocation7 + $0x2c8] sm:$0xff] %v1361_v28  ;;  %v1038_v20 = vmul.f32 %v1639_v7, %v2253_v43  ;;  %v1039_v38 = vmul.f32 %v1640_v11, %v2253_v43  ;;  %v1645_v43 = vld [vmem:[#allocation5 + $0x10] sm:$0xff]  ;;  %v1658_v14 = vld [vmem:[#allocation2 + $0x108] sm:$0xff]  ;;  %v1659_v11 = vld [vmem:[#allocation5 + $0x100] sm:$0xff] }
 0x331   :  { %1490 = vst [vmem:[#allocation7 + $0x2d0] sm:$0xff] %v1362_v29  ;;  %v936_v59 = vpop.permute.xlu2 %935  ;;  %v1641_v29 = vld [vmem:[#allocation2] sm:$0xff] }
 0x332   :  { %1491 = vst [vmem:[#allocation7 + $0x2d8] sm:$0xff] %v1363_v44  ;;  %v1160_v5 = vmul.f32 %v1627_v58, %v936_v59  ;;  %v1161_v15 = vmul.f32 %v1628_v9, %v936_v59  ;;  %v1162_v31 = vmul.f32 %v1629_v19, %v936_v59  ;;  %v1163_v52 = vmul.f32 %v1630_v61, %v936_v59 }
 0x333   :  { %1492 = vst [vmem:[#allocation7 + $0x2e0] sm:$0xff] %v1364_v47  ;;  %v1164_v23 = vmul.f32 %v1632_v22, %v936_v59  ;;  %v1165_v26 = vmul.f32 %v1634_v60, %v936_v59  ;;  %v1166_v56 = vmul.f32 %v1636_v18, %v936_v59  ;;  %v1167_v50 = vmul.f32 %v1637_v33, %v936_v59  ;;  %v1648_v59 = vld [vmem:[#allocation5 + $0x20] sm:$0xff]  ;;  %v1654_v60 = vld [vmem:[#allocation2 + $0x28] sm:$0xff] }
 0x334   :  { %1493 = vst [vmem:[#allocation7 + $0x2e8] sm:$0xff] %v1365_v48  ;;  %v1288_v12 = vadd.f32 %v1160_v5, %v1032_v1  ;;  %v1289_v8 = vadd.f32 %v1161_v15, %v1033_v32  ;;  %v1290_v2 = vadd.f32 %v1162_v31, %v1034_v55  ;;  %v1291_v24 = vadd.f32 %v1163_v52, %v1035_v25  ;;  %v1644_v48 = vld [vmem:[#allocation5 + $0x8] sm:$0xff]  ;;  %v1649_v5 = vld [vmem:[#allocation2 + $0x18] sm:$0xff]  ;;  %v1651_v52 = vld [vmem:[#allocation2 + $0x20] sm:$0xff] }
 0x335   :  { %1494 = vst [vmem:[#allocation7 + $0x2f0] sm:$0xff] %v1366_v37  ;;  %v1292_v3 = vadd.f32 %v1164_v23, %v1036_v13  ;;  %v1293_v28 = vadd.f32 %v1165_v26, %v1037_v62  ;;  %v1016_v40 = vmul.f32 %v1641_v29, %v2250_v34  ;;  %v1017_v44 = vmul.f32 %v1642_v42, %v2250_v34  ;;  %v1647_v37 = vld [vmem:[#allocation2 + $0x10] sm:$0xff]  ;;  %v1650_v15 = vld [vmem:[#allocation5 + $0x28] sm:$0xff]  ;;  %v1653_v23 = vld [vmem:[#allocation5 + $0x38] sm:$0xff] }
 0x336   :  { %1495 = vst [vmem:[#allocation7 + $0x2f8] sm:$0xff] %v1367_v46  ;;  %v1294_v45 = vadd.f32 %v1166_v56, %v1038_v20  ;;  %v1295_v51 = vadd.f32 %v1167_v50, %v1039_v38  ;;  %v1018_v46 = vmul.f32 %v1647_v37, %v2250_v34  ;;  %v1019_v9 = vmul.f32 %v1649_v5, %v2250_v34  ;;  %v1652_v55 = vld [vmem:[#allocation5 + $0x30] sm:$0xff]  ;;  %v1656_v13 = vld [vmem:[#allocation2 + $0x38] sm:$0xff]  ;;  %v1657_v50 = vld [vmem:[#allocation2 + $0x100] sm:$0xff] }
 0x337   :  { %1416 = vst [vmem:[#allocation7 + $0x80] sm:$0xff] %v1288_v12  ;;  %v1020_v16 = vmul.f32 %v1651_v52, %v2250_v34  ;;  %v1021_v26 = vmul.f32 %v1654_v60, %v2250_v34  ;;  %v1023_v18 = vmul.f32 %v1656_v13, %v2250_v34  ;;  %v1049_v62 = vmul.f32 %v1658_v14, %v2267_v27  ;;  %v1668_v37 = vld [vmem:[#allocation5 + $0x130] sm:$0xff]  ;;  %v1672_v52 = vld [vmem:[#allocation2 + $0x138] sm:$0xff] }
 0x338   :  { %1417 = vst [vmem:[#allocation7 + $0x88] sm:$0xff] %v1289_v8  ;;  %v1655_v8 = vld [vmem:[#allocation2 + $0x30] sm:$0xff] }
 0x339   :  { %1418 = vst [vmem:[#allocation7 + $0x90] sm:$0xff] %v1290_v2  ;;  %v924_v53 = vpop.permute.xlu1 %923  ;;  %v1022_v30 = vmul.f32 %v1655_v8, %v2250_v34  ;;  %v1048_v2 = vmul.f32 %v1657_v50, %v2267_v27  ;;  %v1661_v34 = vld [vmem:[#allocation5 + $0x110] sm:$0xff]  ;;  %v1678_v50 = vld [vmem:[#allocation5 + $0xd8] sm:$0xff] }
 0x33a   :  { %1419 = vst [vmem:[#allocation7 + $0x98] sm:$0xff] %v1291_v24  ;;  %v1144_v47 = vmul.f32 %v1643_v63, %v924_v53  ;;  %v1145_v54 = vmul.f32 %v1644_v48, %v924_v53  ;;  %v1146_v1 = vmul.f32 %v1645_v43, %v924_v53  ;;  %v1147_v32 = vmul.f32 %v1646_v57, %v924_v53  ;;  %v1665_v63 = vld [vmem:[#allocation2 + $0x118] sm:$0xff]  ;;  %v1666_v48 = vld [vmem:[#allocation5 + $0x128] sm:$0xff]  ;;  %v1667_v57 = vld [vmem:[#allocation2 + $0x120] sm:$0xff] }
 0x33b   :  { %1420 = vst [vmem:[#allocation7 + $0xa0] sm:$0xff] %v1292_v3  ;;  %v1148_v58 = vmul.f32 %v1648_v59, %v924_v53  ;;  %v1149_v19 = vmul.f32 %v1650_v15, %v924_v53  ;;  %v1150_v22 = vmul.f32 %v1652_v55, %v924_v53  ;;  %v1151_v4 = vmul.f32 %v1653_v23, %v924_v53  ;;  %v1660_v3 = vld [vmem:[#allocation5 + $0x108] sm:$0xff]  ;;  %v1669_v59 = vld [vmem:[#allocation5 + $0x138] sm:$0xff]  ;;  %v1673_v23 = vld [vmem:[#allocation2 + $0xc0] sm:$0xff] }
 0x33c   :  { %1421 = vst [vmem:[#allocation7 + $0xa8] sm:$0xff] %v1293_v28  ;;  %v1272_v31 = vadd.f32 %v1144_v47, %v1016_v40  ;;  %v1273_v61 = vadd.f32 %v1145_v54, %v1017_v44  ;;  %v1274_v25 = vadd.f32 %v1146_v1, %v1018_v46  ;;  %v1275_v12 = vadd.f32 %v1147_v32, %v1019_v9  ;;  %v1662_v40 = vld [vmem:[#allocation5 + $0x118] sm:$0xff]  ;;  %v1663_v44 = vld [vmem:[#allocation2 + $0x110] sm:$0xff]  ;;  %v1670_v9 = vld [vmem:[#allocation2 + $0x128] sm:$0xff] }
 0x33d   :  { %1422 = vst [vmem:[#allocation7 + $0xb0] sm:$0xff] %v1294_v45  ;;  %v1276_v56 = vadd.f32 %v1148_v58, %v1020_v16  ;;  %v1277_v33 = vadd.f32 %v1149_v19, %v1021_v26  ;;  %v1278_v24 = vadd.f32 %v1150_v22, %v1022_v30  ;;  %v1279_v7 = vadd.f32 %v1151_v4, %v1023_v18  ;;  %v1675_v30 = vld [vmem:[#allocation5 + $0xc0] sm:$0xff]  ;;  %v1676_v18 = vld [vmem:[#allocation5 + $0xc8] sm:$0xff]  ;;  %v1679_v14 = vld [vmem:[#allocation2 + $0xd0] sm:$0xff] }
 0x33e   :  { %1423 = vst [vmem:[#allocation7 + $0xb8] sm:$0xff] %v1295_v51  ;;  %v1050_v45 = vmul.f32 %v1663_v44, %v2267_v27  ;;  %v1664_v51 = vld [vmem:[#allocation5 + $0x120] sm:$0xff]  ;;  %v1051_v47 = vmul.f32 %v1665_v63, %v2267_v27  ;;  %v1052_v32 = vmul.f32 %v1667_v57, %v2267_v27  ;;  %v1053_v15 = vmul.f32 %v1670_v9, %v2267_v27  ;;  %v1686_v63 = vld [vmem:[#allocation2 + $0xe8] sm:$0xff] }
 0x33f   :  { %1400 = vst [vmem:[#allocation7] sm:$0xff] %v1272_v31  ;;  %v1671_v31 = vld [vmem:[#allocation2 + $0x130] sm:$0xff]  ;;  %v1055_v16 = vmul.f32 %v1672_v52, %v2267_v27  ;;  %v1040_v4 = vmul.f32 %v1673_v23, %v2259_v35  ;;  %v1692_v52 = vld [vmem:[#allocation5 + $0x1c8] sm:$0xff] }
 0x340   :  { %1401 = vst [vmem:[#allocation7 + $0x8] sm:$0xff] %v1273_v61  ;;  %v1054_v61 = vmul.f32 %v1671_v31, %v2267_v27  ;;  %v1677_v27 = vld [vmem:[#allocation5 + $0xd0] sm:$0xff]  ;;  %v1691_v31 = vld [vmem:[#allocation5 + $0x1c0] sm:$0xff] }
 0x341   :  { %1402 = vst [vmem:[#allocation7 + $0x10] sm:$0xff] %v1274_v25  ;;  %v948_v20 = vpop.permute.xlu2 %947  ;;  %v1674_v25 = vld [vmem:[#allocation2 + $0xc8] sm:$0xff] }
 0x342   :  { %1403 = vst [vmem:[#allocation7 + $0x18] sm:$0xff] %v1275_v12  ;;  %v1176_v38 = vmul.f32 %v1659_v11, %v948_v20  ;;  %v1177_v28 = vmul.f32 %v1660_v3, %v948_v20  ;;  %v1178_v29 = vmul.f32 %v1661_v34, %v948_v20  ;;  %v1179_v42 = vmul.f32 %v1662_v40, %v948_v20 }
 0x343   :  { %1404 = vst [vmem:[#allocation7 + $0x20] sm:$0xff] %v1276_v56  ;;  %v1180_v53 = vmul.f32 %v1664_v51, %v948_v20  ;;  %v1181_v54 = vmul.f32 %v1666_v48, %v948_v20  ;;  %v1182_v46 = vmul.f32 %v1668_v37, %v948_v20  ;;  %v1183_v58 = vmul.f32 %v1669_v59, %v948_v20  ;;  %v1681_v20 = vld [vmem:[#allocation2 + $0xd8] sm:$0xff] }
 0x344   :  { %1405 = vst [vmem:[#allocation7 + $0x28] sm:$0xff] %v1277_v33  ;;  %v1304_v43 = vadd.f32 %v1176_v38, %v1048_v2  ;;  %v1305_v1 = vadd.f32 %v1177_v28, %v1049_v62  ;;  %v1306_v5 = vadd.f32 %v1178_v29, %v1050_v45  ;;  %v1307_v19 = vadd.f32 %v1179_v42, %v1051_v47  ;;  %v1682_v38 = vld [vmem:[#allocation5 + $0xe8] sm:$0xff]  ;;  %v1683_v29 = vld [vmem:[#allocation2 + $0xe0] sm:$0xff]  ;;  %v1684_v42 = vld [vmem:[#allocation5 + $0xf0] sm:$0xff] }
 0x345   :  { %1406 = vst [vmem:[#allocation7 + $0x30] sm:$0xff] %v1278_v24  ;;  %v1308_v55 = vadd.f32 %v1180_v53, %v1052_v32  ;;  %v1309_v22 = vadd.f32 %v1181_v54, %v1053_v15  ;;  %v1041_v60 = vmul.f32 %v1674_v25, %v2259_v35  ;;  %v1310_v26 = vadd.f32 %v1182_v46, %v1054_v61  ;;  %v1680_v24 = vld [vmem:[#allocation5 + $0xe0] sm:$0xff]  ;;  %v1685_v45 = vld [vmem:[#allocation5 + $0xf8] sm:$0xff]  ;;  %v1687_v54 = vld [vmem:[#allocation2 + $0xf0] sm:$0xff] }
 0x346   :  { %1407 = vst [vmem:[#allocation7 + $0x38] sm:$0xff] %v1279_v7  ;;  %v1311_v12 = vadd.f32 %v1183_v58, %v1055_v16  ;;  %v1042_v62 = vmul.f32 %v1679_v14, %v2259_v35  ;;  %v1043_v11 = vmul.f32 %v1681_v20, %v2259_v35  ;;  %v1044_v40 = vmul.f32 %v1683_v29, %v2259_v35  ;;  %v1689_v46 = vld [vmem:[#allocation2 + $0x1c0] sm:$0xff]  ;;  %v1690_v58 = vld [vmem:[#allocation2 + $0x1c8] sm:$0xff]  ;;  %v1701_v14 = vld [vmem:[#allocation5 + $0x1f8] sm:$0xff] }
 0x347   :  { %1432 = vst [vmem:[#allocation7 + $0x100] sm:$0xff] %v1304_v43  ;;  %v1045_v47 = vmul.f32 %v1686_v63, %v2259_v35  ;;  %v1046_v43 = vmul.f32 %v1687_v54, %v2259_v35  ;;  %v1072_v59 = vmul.f32 %v1689_v46, %v2255_v0  ;;  %v1711_v46 = vld [vmem:[#allocation2 + $0x150] sm:$0xff] }
 0x348   :  { %1433 = vst [vmem:[#allocation7 + $0x108] sm:$0xff] %v1305_v1  ;;  %v1688_v1 = vld [vmem:[#allocation2 + $0xf8] sm:$0xff] }
 0x349   :  { %1434 = vst [vmem:[#allocation7 + $0x110] sm:$0xff] %v1306_v5  ;;  %v942_v8 = vpop.permute.xlu1 %941  ;;  %v1047_v57 = vmul.f32 %v1688_v1, %v2259_v35  ;;  %v1073_v5 = vmul.f32 %v1690_v58, %v2255_v0  ;;  %v1693_v35 = vld [vmem:[#allocation5 + $0x1d0] sm:$0xff]  ;;  %v1712_v58 = vld [vmem:[#allocation5 + $0x160] sm:$0xff] }
 0x34a   :  { %1435 = vst [vmem:[#allocation7 + $0x118] sm:$0xff] %v1307_v19  ;;  %v1168_v13 = vmul.f32 %v1675_v30, %v942_v8  ;;  %v1169_v56 = vmul.f32 %v1676_v18, %v942_v8  ;;  %v1170_v33 = vmul.f32 %v1677_v27, %v942_v8  ;;  %v1171_v2 = vmul.f32 %v1678_v50, %v942_v8  ;;  %v1698_v30 = vld [vmem:[#allocation5 + $0x1e8] sm:$0xff]  ;;  %v1699_v27 = vld [vmem:[#allocation2 + $0x1e0] sm:$0xff]  ;;  %v1700_v50 = vld [vmem:[#allocation5 + $0x1f0] sm:$0xff] }
 0x34b   :  { %1436 = vst [vmem:[#allocation7 + $0x120] sm:$0xff] %v1308_v55  ;;  %v1172_v7 = vmul.f32 %v1680_v24, %v942_v8  ;;  %v1173_v3 = vmul.f32 %v1682_v38, %v942_v8  ;;  %v1174_v44 = vmul.f32 %v1684_v42, %v942_v8  ;;  %v1175_v51 = vmul.f32 %v1685_v45, %v942_v8  ;;  %v1703_v38 = vld [vmem:[#allocation2 + $0x1f0] sm:$0xff]  ;;  %v1705_v42 = vld [vmem:[#allocation2 + $0x140] sm:$0xff]  ;;  %v1706_v45 = vld [vmem:[#allocation2 + $0x148] sm:$0xff] }
 0x34c   :  { %1437 = vst [vmem:[#allocation7 + $0x128] sm:$0xff] %v1309_v22  ;;  %v1296_v28 = vadd.f32 %v1168_v13, %v1040_v4  ;;  %v1297_v34 = vadd.f32 %v1169_v56, %v1041_v60  ;;  %v1298_v53 = vadd.f32 %v1170_v33, %v1042_v62  ;;  %v1299_v48 = vadd.f32 %v1171_v2, %v1043_v11  ;;  %v1694_v22 = vld [vmem:[#allocation5 + $0x1d8] sm:$0xff]  ;;  %v1695_v4 = vld [vmem:[#allocation2 + $0x1d0] sm:$0xff]  ;;  %v1696_v60 = vld [vmem:[#allocation5 + $0x1e0] sm:$0xff] }
 0x34d   :  { %1438 = vst [vmem:[#allocation7 + $0x130] sm:$0xff] %v1310_v26  ;;  %v1300_v32 = vadd.f32 %v1172_v7, %v1044_v40  ;;  %v1301_v37 = vadd.f32 %v1173_v3, %v1045_v47  ;;  %v1302_v9 = vadd.f32 %v1174_v44, %v1046_v43  ;;  %v1303_v15 = vadd.f32 %v1175_v51, %v1047_v57  ;;  %v1702_v7 = vld [vmem:[#allocation2 + $0x1e8] sm:$0xff] }
 0x34e   :  { %1439 = vst [vmem:[#allocation7 + $0x138] sm:$0xff] %v1311_v12  ;;  %v1074_v25 = vmul.f32 %v1695_v4, %v2255_v0  ;;  %v1697_v12 = vld [vmem:[#allocation2 + $0x1d8] sm:$0xff]  ;;  %v1076_v33 = vmul.f32 %v1699_v27, %v2255_v0  ;;  %v1077_v20 = vmul.f32 %v1702_v7, %v2255_v0  ;;  %v1078_v3 = vmul.f32 %v1703_v38, %v2255_v0  ;;  %v1708_v43 = vld [vmem:[#allocation5 + $0x148] sm:$0xff] }
 0x34f   :  { %1424 = vst [vmem:[#allocation7 + $0xc0] sm:$0xff] %v1296_v28  ;;  %v1075_v8 = vmul.f32 %v1697_v12, %v2255_v0  ;;  %v1704_v28 = vld [vmem:[#allocation2 + $0x1f8] sm:$0xff]  ;;  %v1056_v44 = vmul.f32 %v1705_v42, %v2265_v49  ;;  %v1057_v51 = vmul.f32 %v1706_v45, %v2265_v49  ;;  %v1724_v38 = vld [vmem:[#allocation5 + $0x248] sm:$0xff] }
 0x350   :  { %1425 = vst [vmem:[#allocation7 + $0xc8] sm:$0xff] %v1297_v34  ;;  %v1079_v34 = vmul.f32 %v1704_v28, %v2255_v0  ;;  %v1709_v0 = vld [vmem:[#allocation5 + $0x150] sm:$0xff] }
 0x351   :  { %1426 = vst [vmem:[#allocation7 + $0xd0] sm:$0xff] %v1298_v53  ;;  %v966_v19 = vpop.permute.xlu2 %965 }
 0x352   :  { %1427 = vst [vmem:[#allocation7 + $0xd8] sm:$0xff] %v1299_v48  ;;  %v1200_v61 = vmul.f32 %v1691_v31, %v966_v19  ;;  %v1201_v16 = vmul.f32 %v1692_v52, %v966_v19  ;;  %v1202_v55 = vmul.f32 %v1693_v35, %v966_v19  ;;  %v1203_v23 = vmul.f32 %v1694_v22, %v966_v19  ;;  %v1707_v48 = vld [vmem:[#allocation5 + $0x140] sm:$0xff] }
 0x353   :  { %1428 = vst [vmem:[#allocation7 + $0xe0] sm:$0xff] %v1300_v32  ;;  %v1204_v26 = vmul.f32 %v1696_v60, %v966_v19  ;;  %v1205_v13 = vmul.f32 %v1698_v30, %v966_v19  ;;  %v1206_v2 = vmul.f32 %v1700_v50, %v966_v19  ;;  %v1207_v62 = vmul.f32 %v1701_v14, %v966_v19  ;;  %v1710_v32 = vld [vmem:[#allocation5 + $0x158] sm:$0xff]  ;;  %v1714_v19 = vld [vmem:[#allocation5 + $0x168] sm:$0xff] }
 0x354   :  { %1429 = vst [vmem:[#allocation7 + $0xe8] sm:$0xff] %v1301_v37  ;;  %v1328_v18 = vadd.f32 %v1200_v61, %v1072_v59  ;;  %v1329_v56 = vadd.f32 %v1201_v16, %v1073_v5  ;;  %v1330_v24 = vadd.f32 %v1202_v55, %v1074_v25  ;;  %v1331_v11 = vadd.f32 %v1203_v23, %v1075_v8  ;;  %v1715_v16 = vld [vmem:[#allocation2 + $0x160] sm:$0xff]  ;;  %v1716_v55 = vld [vmem:[#allocation5 + $0x170] sm:$0xff]  ;;  %v1717_v23 = vld [vmem:[#allocation5 + $0x178] sm:$0xff] }
 0x355   :  { %1430 = vst [vmem:[#allocation7 + $0xf0] sm:$0xff] %v1302_v9  ;;  %v1332_v29 = vadd.f32 %v1204_v26, %v1076_v33  ;;  %v1333_v40 = vadd.f32 %v1205_v13, %v1077_v20  ;;  %v1334_v53 = vadd.f32 %v1206_v2, %v1078_v3  ;;  %v1335_v63 = vadd.f32 %v1207_v62, %v1079_v34  ;;  %v1713_v9 = vld [vmem:[#allocation2 + $0x158] sm:$0xff]  ;;  %v1718_v60 = vld [vmem:[#allocation2 + $0x168] sm:$0xff]  ;;  %v1719_v8 = vld [vmem:[#allocation2 + $0x170] sm:$0xff] }
 0x356   :  { %1431 = vst [vmem:[#allocation7 + $0xf8] sm:$0xff] %v1303_v15  ;;  %v1058_v59 = vmul.f32 %v1711_v46, %v2265_v49  ;;  %v1059_v15 = vmul.f32 %v1713_v9, %v2265_v49  ;;  %v1060_v35 = vmul.f32 %v1715_v16, %v2265_v49  ;;  %v1061_v26 = vmul.f32 %v1718_v60, %v2265_v49  ;;  %v1720_v13 = vld [vmem:[#allocation2 + $0x178] sm:$0xff]  ;;  %v1721_v33 = vld [vmem:[#allocation2 + $0x240] sm:$0xff]  ;;  %v1722_v2 = vld [vmem:[#allocation2 + $0x248] sm:$0xff] }
 0x357   :  { %1456 = vst [vmem:[#allocation7 + $0x1c0] sm:$0xff] %v1328_v18  ;;  %v1062_v30 = vmul.f32 %v1719_v8, %v2265_v49  ;;  %v1063_v18 = vmul.f32 %v1720_v13, %v2265_v49  ;;  %v1088_v50 = vmul.f32 %v1721_v33, %v2292_v10  ;;  %v1089_v14 = vmul.f32 %v1722_v2, %v2292_v10  ;;  %v1723_v20 = vld [vmem:[#allocation5 + $0x240] sm:$0xff]  ;;  %v1725_v49 = vld [vmem:[#allocation5 + $0x250] sm:$0xff]  ;;  %v1726_v34 = vld [vmem:[#allocation5 + $0x258] sm:$0xff] }
 0x358   :  { %1457 = vst [vmem:[#allocation7 + $0x1c8] sm:$0xff] %v1329_v56  ;;  %v1735_v9 = vld [vmem:[#allocation2 + $0x270] sm:$0xff]  ;;  %v1737_v16 = vld [vmem:[#allocation2 + $0x200] sm:$0xff]  ;;  %v1742_v13 = vld [vmem:[#allocation5 + $0x218] sm:$0xff] }
 0x359   :  { %1458 = vst [vmem:[#allocation7 + $0x1d0] sm:$0xff] %v1330_v24  ;;  %v954_v47 = vpop.permute.xlu1 %953  ;;  %v1739_v60 = vld [vmem:[#allocation5 + $0x200] sm:$0xff]  ;;  %v1745_v2 = vld [vmem:[#allocation2 + $0x218] sm:$0xff] }
 0x35a   :  { %1459 = vst [vmem:[#allocation7 + $0x1d8] sm:$0xff] %v1331_v11  ;;  %v1184_v54 = vmul.f32 %v1707_v48, %v954_v47  ;;  %v1185_v1 = vmul.f32 %v1708_v43, %v954_v47  ;;  %v1186_v57 = vmul.f32 %v1709_v0, %v954_v47  ;;  %v1187_v37 = vmul.f32 %v1710_v32, %v954_v47  ;;  %v1731_v43 = vld [vmem:[#allocation2 + $0x260] sm:$0xff]  ;;  %v1732_v0 = vld [vmem:[#allocation5 + $0x270] sm:$0xff]  ;;  %v1733_v32 = vld [vmem:[#allocation5 + $0x278] sm:$0xff] }
 0x35b   :  { %1460 = vst [vmem:[#allocation7 + $0x1e0] sm:$0xff] %v1332_v29  ;;  %v1188_v5 = vmul.f32 %v1712_v58, %v954_v47  ;;  %v1189_v31 = vmul.f32 %v1714_v19, %v954_v47  ;;  %v1190_v22 = vmul.f32 %v1716_v55, %v954_v47  ;;  %v1191_v4 = vmul.f32 %v1717_v23, %v954_v47  ;;  %v1736_v19 = vld [vmem:[#allocation2 + $0x278] sm:$0xff]  ;;  %v1738_v55 = vld [vmem:[#allocation2 + $0x208] sm:$0xff]  ;;  %v1744_v33 = vld [vmem:[#allocation5 + $0x220] sm:$0xff] }
 0x35c   :  { %1461 = vst [vmem:[#allocation7 + $0x1e8] sm:$0xff] %v1333_v40  ;;  %v1312_v61 = vadd.f32 %v1184_v54, %v1056_v44  ;;  %v1313_v52 = vadd.f32 %v1185_v1, %v1057_v51  ;;  %v1314_v25 = vadd.f32 %v1186_v57, %v1058_v59  ;;  %v1315_v12 = vadd.f32 %v1187_v37, %v1059_v15  ;;  %v1727_v40 = vld [vmem:[#allocation2 + $0x250] sm:$0xff]  ;;  %v1728_v44 = vld [vmem:[#allocation5 + $0x260] sm:$0xff]  ;;  %v1729_v51 = vld [vmem:[#allocation2 + $0x258] sm:$0xff] }
 0x35d   :  { %1462 = vst [vmem:[#allocation7 + $0x1f0] sm:$0xff] %v1334_v53  ;;  %v1316_v56 = vadd.f32 %v1188_v5, %v1060_v35  ;;  %v1317_v27 = vadd.f32 %v1189_v31, %v1061_v26  ;;  %v1318_v62 = vadd.f32 %v1190_v22, %v1062_v30  ;;  %v1319_v24 = vadd.f32 %v1191_v4, %v1063_v18  ;;  %v1734_v59 = vld [vmem:[#allocation2 + $0x268] sm:$0xff] }
 0x35e   :  { %1463 = vst [vmem:[#allocation7 + $0x1f8] sm:$0xff] %v1335_v63  ;;  %v1090_v42 = vmul.f32 %v1727_v40, %v2292_v10  ;;  %v1091_v53 = vmul.f32 %v1729_v51, %v2292_v10  ;;  %v1730_v63 = vld [vmem:[#allocation5 + $0x268] sm:$0xff]  ;;  %v1092_v1 = vmul.f32 %v1731_v43, %v2292_v10  ;;  %v1093_v58 = vmul.f32 %v1734_v59, %v2292_v10 }
 0x35f   :  { %1440 = vst [vmem:[#allocation7 + $0x140] sm:$0xff] %v1312_v61  ;;  %v1094_v15 = vmul.f32 %v1735_v9, %v2292_v10  ;;  %v1095_v31 = vmul.f32 %v1736_v19, %v2292_v10  ;;  %v1080_v35 = vmul.f32 %v1737_v16, %v2271_v39  ;;  %v1081_v22 = vmul.f32 %v1738_v55, %v2271_v39  ;;  %v1741_v10 = vld [vmem:[#allocation5 + $0x210] sm:$0xff]  ;;  %v1750_v40 = vld [vmem:[#allocation2 + $0x228] sm:$0xff] }
 0x360   :  { %1441 = vst [vmem:[#allocation7 + $0x148] sm:$0xff] %v1313_v52 }
 0x361   :  { %1442 = vst [vmem:[#allocation7 + $0x150] sm:$0xff] %v1314_v25  ;;  %v979_v7 = vpop.permute.xlu2 %978 }
 0x362   :  { %1443 = vst [vmem:[#allocation7 + $0x158] sm:$0xff] %v1315_v12  ;;  %v1216_v11 = vmul.f32 %v1723_v20, %v979_v7  ;;  %v1217_v3 = vmul.f32 %v1724_v38, %v979_v7  ;;  %v1218_v28 = vmul.f32 %v1725_v49, %v979_v7  ;;  %v1219_v29 = vmul.f32 %v1726_v34, %v979_v7  ;;  %v1740_v12 = vld [vmem:[#allocation5 + $0x208] sm:$0xff] }
 0x363   :  { %1444 = vst [vmem:[#allocation7 + $0x160] sm:$0xff] %v1316_v56  ;;  %v1220_v45 = vmul.f32 %v1728_v44, %v979_v7  ;;  %v1221_v47 = vmul.f32 %v1730_v63, %v979_v7  ;;  %v1222_v57 = vmul.f32 %v1732_v0, %v979_v7  ;;  %v1223_v37 = vmul.f32 %v1733_v32, %v979_v7  ;;  %v1743_v56 = vld [vmem:[#allocation2 + $0x210] sm:$0xff] }
 0x364   :  { %1445 = vst [vmem:[#allocation7 + $0x168] sm:$0xff] %v1317_v27  ;;  %v1344_v48 = vadd.f32 %v1216_v11, %v1088_v50  ;;  %v1345_v54 = vadd.f32 %v1217_v3, %v1089_v14  ;;  %v1346_v46 = vadd.f32 %v1218_v28, %v1090_v42  ;;  %v1347_v5 = vadd.f32 %v1219_v29, %v1091_v53  ;;  %v1747_v11 = vld [vmem:[#allocation2 + $0x220] sm:$0xff]  ;;  %v1748_v3 = vld [vmem:[#allocation5 + $0x230] sm:$0xff]  ;;  %v1749_v28 = vld [vmem:[#allocation5 + $0x238] sm:$0xff] }
 0x365   :  { %1446 = vst [vmem:[#allocation7 + $0x170] sm:$0xff] %v1318_v62  ;;  %v1348_v61 = vadd.f32 %v1220_v45, %v1092_v1  ;;  %v1349_v52 = vadd.f32 %v1221_v47, %v1093_v58  ;;  %v1350_v23 = vadd.f32 %v1222_v57, %v1094_v15  ;;  %v1351_v4 = vadd.f32 %v1223_v37, %v1095_v31  ;;  %v1746_v62 = vld [vmem:[#allocation5 + $0x228] sm:$0xff]  ;;  %v1751_v45 = vld [vmem:[#allocation2 + $0x230] sm:$0xff]  ;;  %v1752_v53 = vld [vmem:[#allocation2 + $0x238] sm:$0xff] }
 0x366   :  { %1447 = vst [vmem:[#allocation7 + $0x178] sm:$0xff] %v1319_v24  ;;  %v1082_v27 = vmul.f32 %v1743_v56, %v2271_v39  ;;  %v1083_v14 = vmul.f32 %v1745_v2, %v2271_v39  ;;  %v1084_v38 = vmul.f32 %v1747_v11, %v2271_v39  ;;  %v1085_v42 = vmul.f32 %v1750_v40, %v2271_v39  ;;  %v1754_v1 = vld [vmem:[#allocation2 + $0x308] sm:$0xff]  ;;  %v1758_v15 = vld [vmem:[#allocation5 + $0x318] sm:$0xff]  ;;  %v1759_v31 = vld [vmem:[#allocation2 + $0x310] sm:$0xff] }
 0x367   :  { %1472 = vst [vmem:[#allocation7 + $0x240] sm:$0xff] %v1344_v48  ;;  %v1086_v51 = vmul.f32 %v1751_v45, %v2271_v39  ;;  %v1087_v63 = vmul.f32 %v1752_v53, %v2271_v39  ;;  %v1113_v0 = vmul.f32 %v1754_v1, %v2261_v17  ;;  %v1756_v58 = vld [vmem:[#allocation5 + $0x308] sm:$0xff]  ;;  %v1757_v39 = vld [vmem:[#allocation5 + $0x310] sm:$0xff]  ;;  %v1768_v2 = vld [vmem:[#allocation2 + $0x338] sm:$0xff] }
 0x368   :  { %1473 = vst [vmem:[#allocation7 + $0x248] sm:$0xff] %v1345_v54  ;;  %v1753_v54 = vld [vmem:[#allocation2 + $0x300] sm:$0xff]  ;;  %v1770_v11 = vld [vmem:[#allocation2 + $0x288] sm:$0xff]  ;;  %v1774_v45 = vld [vmem:[#allocation5 + $0x298] sm:$0xff] }
 0x369   :  { %1474 = vst [vmem:[#allocation7 + $0x250] sm:$0xff] %v1346_v46  ;;  %v973_v25 = vpop.permute.xlu1 %972  ;;  %v1112_v43 = vmul.f32 %v1753_v54, %v2261_v17  ;;  %v1755_v46 = vld [vmem:[#allocation5 + $0x300] sm:$0xff]  ;;  %v1772_v40 = vld [vmem:[#allocation5 + $0x288] sm:$0xff]  ;;  %v1775_v53 = vld [vmem:[#allocation2 + $0x290] sm:$0xff] }
 0x36a   :  { %1475 = vst [vmem:[#allocation7 + $0x258] sm:$0xff] %v1347_v5  ;;  %v1208_v26 = vmul.f32 %v1739_v60, %v973_v25  ;;  %v1209_v8 = vmul.f32 %v1740_v12, %v973_v25  ;;  %v1210_v30 = vmul.f32 %v1741_v10, %v973_v25  ;;  %v1211_v18 = vmul.f32 %v1742_v13, %v973_v25  ;;  %v1763_v60 = vld [vmem:[#allocation2 + $0x320] sm:$0xff]  ;;  %v1764_v12 = vld [vmem:[#allocation5 + $0x330] sm:$0xff]  ;;  %v1765_v10 = vld [vmem:[#allocation5 + $0x338] sm:$0xff] }
 0x36b   :  { %1476 = vst [vmem:[#allocation7 + $0x260] sm:$0xff] %v1348_v61  ;;  %v1212_v50 = vmul.f32 %v1744_v33, %v973_v25  ;;  %v1213_v24 = vmul.f32 %v1746_v62, %v973_v25  ;;  %v1214_v49 = vmul.f32 %v1748_v3, %v973_v25  ;;  %v1215_v34 = vmul.f32 %v1749_v28, %v973_v25  ;;  %v1767_v33 = vld [vmem:[#allocation2 + $0x330] sm:$0xff]  ;;  %v1777_v54 = vld [vmem:[#allocation2 + $0x298] sm:$0xff]  ;;  %v1778_v1 = vld [vmem:[#allocation5 + $0x2a8] sm:$0xff] }
 0x36c   :  { %1477 = vst [vmem:[#allocation7 + $0x268] sm:$0xff] %v1349_v52  ;;  %v1336_v7 = vadd.f32 %v1208_v26, %v1080_v35  ;;  %v1337_v20 = vadd.f32 %v1209_v8, %v1081_v22  ;;  %v1338_v29 = vadd.f32 %v1210_v30, %v1082_v27  ;;  %v1339_v44 = vadd.f32 %v1211_v18, %v1083_v14  ;;  %v1760_v52 = vld [vmem:[#allocation5 + $0x320] sm:$0xff]  ;;  %v1761_v35 = vld [vmem:[#allocation2 + $0x318] sm:$0xff]  ;;  %v1762_v22 = vld [vmem:[#allocation5 + $0x328] sm:$0xff] }
 0x36d   :  { %1478 = vst [vmem:[#allocation7 + $0x270] sm:$0xff] %v1350_v23  ;;  %v1340_v47 = vadd.f32 %v1212_v50, %v1084_v38  ;;  %v1341_v48 = vadd.f32 %v1213_v24, %v1085_v42  ;;  %v1342_v57 = vadd.f32 %v1214_v49, %v1086_v51  ;;  %v1343_v32 = vadd.f32 %v1215_v34, %v1087_v63  ;;  %v1766_v18 = vld [vmem:[#allocation2 + $0x328] sm:$0xff]  ;;  %v1771_v34 = vld [vmem:[#allocation5 + $0x280] sm:$0xff] }
 0x36e   :  { %1479 = vst [vmem:[#allocation7 + $0x278] sm:$0xff] %v1351_v4  ;;  %v1114_v61 = vmul.f32 %v1759_v31, %v2261_v17  ;;  %v1115_v55 = vmul.f32 %v1761_v35, %v2261_v17  ;;  %v1116_v26 = vmul.f32 %v1763_v60, %v2261_v17  ;;  %v1117_v56 = vmul.f32 %v1766_v18, %v2261_v17 }
 0x36f   :  { %1464 = vst [vmem:[#allocation7 + $0x200] sm:$0xff] %v1336_v7  ;;  %v1118_v50 = vmul.f32 %v1767_v33, %v2261_v17  ;;  %v1119_v14 = vmul.f32 %v1768_v2, %v2261_v17  ;;  %v1769_v7 = vld [vmem:[#allocation2 + $0x280] sm:$0xff]  ;;  %v1097_v38 = vmul.f32 %v1770_v11, %v2275_v41  ;;  %v1773_v17 = vld [vmem:[#allocation5 + $0x290] sm:$0xff]  ;;  %v1098_v63 = vmul.f32 %v1775_v53, %v2275_v41 }
 0x370   :  { %1465 = vst [vmem:[#allocation7 + $0x208] sm:$0xff] %v1337_v20  ;;  %v1096_v20 = vmul.f32 %v1769_v7, %v2275_v41  ;;  %v1799_v53 = vld [vmem:[#allocation2 + $0x3b0] sm:$0xff] }
 0x371   :  { %1466 = vst [vmem:[#allocation7 + $0x210] sm:$0xff] %v1338_v29  ;;  %v997_v37 = vpop.permute.xlu2 %996 }
 0x372   :  { %1467 = vst [vmem:[#allocation7 + $0x218] sm:$0xff] %v1339_v44  ;;  %v1240_v59 = vmul.f32 %v1755_v46, %v997_v37  ;;  %v1241_v5 = vmul.f32 %v1756_v58, %v997_v37  ;;  %v1242_v9 = vmul.f32 %v1757_v39, %v997_v37  ;;  %v1243_v19 = vmul.f32 %v1758_v15, %v997_v37  ;;  %v1782_v15 = vld [vmem:[#allocation2 + $0x2a8] sm:$0xff] }
 0x373   :  { %1468 = vst [vmem:[#allocation7 + $0x220] sm:$0xff] %v1340_v47  ;;  %v1244_v16 = vmul.f32 %v1760_v52, %v997_v37  ;;  %v1245_v23 = vmul.f32 %v1762_v22, %v997_v37  ;;  %v1246_v8 = vmul.f32 %v1764_v12, %v997_v37  ;;  %v1247_v30 = vmul.f32 %v1765_v10, %v997_v37  ;;  %v1776_v47 = vld [vmem:[#allocation5 + $0x2a0] sm:$0xff] }
 0x374   :  { %1469 = vst [vmem:[#allocation7 + $0x228] sm:$0xff] %v1341_v48  ;;  %v1368_v4 = vadd.f32 %v1240_v59, %v1112_v43  ;;  %v1369_v25 = vadd.f32 %v1241_v5, %v1113_v0  ;;  %v1370_v13 = vadd.f32 %v1242_v9, %v1114_v61  ;;  %v1371_v27 = vadd.f32 %v1243_v19, %v1115_v55  ;;  %v1779_v37 = vld [vmem:[#allocation2 + $0x2a0] sm:$0xff]  ;;  %v1780_v59 = vld [vmem:[#allocation5 + $0x2b0] sm:$0xff]  ;;  %v1781_v5 = vld [vmem:[#allocation5 + $0x2b8] sm:$0xff] }
 0x375   :  { %1470 = vst [vmem:[#allocation7 + $0x230] sm:$0xff] %v1342_v57  ;;  %v1372_v62 = vadd.f32 %v1244_v16, %v1116_v26  ;;  %v1373_v24 = vadd.f32 %v1245_v23, %v1117_v56  ;;  %v1374_v3 = vadd.f32 %v1246_v8, %v1118_v50  ;;  %v1375_v49 = vadd.f32 %v1247_v30, %v1119_v14  ;;  %v1783_v61 = vld [vmem:[#allocation2 + $0x2b0] sm:$0xff]  ;;  %v1784_v16 = vld [vmem:[#allocation2 + $0x2b8] sm:$0xff]  ;;  %v1786_v26 = vld [vmem:[#allocation2 + $0x388] sm:$0xff] }
 0x376   :  { %1471 = vst [vmem:[#allocation7 + $0x238] sm:$0xff] %v1343_v32  ;;  %v1099_v43 = vmul.f32 %v1777_v54, %v2275_v41  ;;  %v1100_v46 = vmul.f32 %v1779_v37, %v2275_v41  ;;  %v1101_v19 = vmul.f32 %v1782_v15, %v2275_v41  ;;  %v1102_v52 = vmul.f32 %v1783_v61, %v2275_v41  ;;  %v1787_v10 = vld [vmem:[#allocation5 + $0x380] sm:$0xff]  ;;  %v1791_v50 = vld [vmem:[#allocation2 + $0x390] sm:$0xff]  ;;  %v1807_v61 = vld [vmem:[#allocation5 + $0x358] sm:$0xff] }
 0x377   :  { %1496 = vst [vmem:[#allocation7 + $0x300] sm:$0xff] %v1368_v4  ;;  %v1103_v35 = vmul.f32 %v1784_v16, %v2275_v41  ;;  %v1129_v12 = vmul.f32 %v1786_v26, %v2305_v36  ;;  %v1789_v41 = vld [vmem:[#allocation5 + $0x390] sm:$0xff]  ;;  %v1130_v2 = vmul.f32 %v1791_v50, %v2305_v36  ;;  %v1792_v14 = vld [vmem:[#allocation5 + $0x3a0] sm:$0xff]  ;;  %v1808_v16 = vld [vmem:[#allocation2 + $0x358] sm:$0xff] }
 0x378   :  { %1497 = vst [vmem:[#allocation7 + $0x308] sm:$0xff] %v1369_v25  ;;  %v1785_v25 = vld [vmem:[#allocation2 + $0x380] sm:$0xff]  ;;  %v1812_v26 = vld [vmem:[#allocation5 + $0x370] sm:$0xff] }
 0x379   :  { %1498 = vst [vmem:[#allocation7 + $0x310] sm:$0xff] %v1370_v13  ;;  %v985_v28 = vpop.permute.xlu1 %984  ;;  %v1128_v60 = vmul.f32 %v1785_v25, %v2305_v36  ;;  %v1788_v13 = vld [vmem:[#allocation5 + $0x388] sm:$0xff] }
 0x37a   :  { %1499 = vst [vmem:[#allocation7 + $0x318] sm:$0xff] %v1371_v27  ;;  %v1224_v29 = vmul.f32 %v1771_v34, %v985_v28  ;;  %v1225_v42 = vmul.f32 %v1772_v40, %v985_v28  ;;  %v1226_v44 = vmul.f32 %v1773_v17, %v985_v28  ;;  %v1227_v51 = vmul.f32 %v1774_v45, %v985_v28  ;;  %v1790_v27 = vld [vmem:[#allocation5 + $0x398] sm:$0xff]  ;;  %v1796_v34 = vld [vmem:[#allocation5 + $0x3b0] sm:$0xff]  ;;  %v1811_v25 = vld [vmem:[#allocation5 + $0x368] sm:$0xff] }
 0x37b   :  { %1500 = vst [vmem:[#allocation7 + $0x320] sm:$0xff] %v1372_v62  ;;  %v1228_v48 = vmul.f32 %v1776_v47, %v985_v28  ;;  %v1229_v0 = vmul.f32 %v1778_v1, %v985_v28  ;;  %v1230_v58 = vmul.f32 %v1780_v59, %v985_v28  ;;  %v1231_v39 = vmul.f32 %v1781_v5, %v985_v28 }
 0x37c   :  { %1501 = vst [vmem:[#allocation7 + $0x328] sm:$0xff] %v1373_v24  ;;  %v1352_v57 = vadd.f32 %v1224_v29, %v1096_v20  ;;  %v1353_v32 = vadd.f32 %v1225_v42, %v1097_v38  ;;  %v1354_v9 = vadd.f32 %v1226_v44, %v1098_v63  ;;  %v1355_v31 = vadd.f32 %v1227_v51, %v1099_v43  ;;  %v1793_v24 = vld [vmem:[#allocation2 + $0x398] sm:$0xff]  ;;  %v1794_v20 = vld [vmem:[#allocation5 + $0x3a8] sm:$0xff] }
 0x37d   :  { %1502 = vst [vmem:[#allocation7 + $0x330] sm:$0xff] %v1374_v3  ;;  %v1356_v55 = vadd.f32 %v1228_v48, %v1100_v46  ;;  %v1357_v22 = vadd.f32 %v1229_v0, %v1101_v19  ;;  %v1358_v23 = vadd.f32 %v1230_v58, %v1102_v52  ;;  %v1359_v4 = vadd.f32 %v1231_v39, %v1103_v35  ;;  %v1797_v42 = vld [vmem:[#allocation2 + $0x3a8] sm:$0xff]  ;;  %v1798_v44 = vld [vmem:[#allocation5 + $0x3b8] sm:$0xff]  ;;  %v1801_v0 = vld [vmem:[#allocation2 + $0x340] sm:$0xff] }
 0x37e   :  { %1503 = vst [vmem:[#allocation7 + $0x338] sm:$0xff] %v1375_v49  ;;  %v1131_v7 = vmul.f32 %v1793_v24, %v2305_v36  ;;  %v1795_v49 = vld [vmem:[#allocation2 + $0x3a0] sm:$0xff]  ;;  %v1133_v17 = vmul.f32 %v1797_v42, %v2305_v36  ;;  %v1134_v63 = vmul.f32 %v1799_v53, %v2305_v36  ;;  %v1800_v48 = vld [vmem:[#allocation2 + $0x3b8] sm:$0xff]  ;;  %v1803_v46 = vld [vmem:[#allocation2 + $0x350] sm:$0xff]  ;;  %v1123_v35 = vmul.f32 %v1808_v16, %v2297_v6 }
 0x37f   :  { %1480 = vst [vmem:[#allocation7 + $0x280] sm:$0xff] %v1352_v57  ;;  %v1132_v28 = vmul.f32 %v1795_v49, %v2305_v36  ;;  %v1135_v54 = vmul.f32 %v1800_v48, %v2305_v36  ;;  %v1120_v57 = vmul.f32 %v1801_v0, %v2297_v6  ;;  %v1122_v59 = vmul.f32 %v1803_v46, %v2297_v6  ;;  %v1804_v39 = vld [vmem:[#allocation5 + $0x340] sm:$0xff]  ;;  %v1805_v36 = vld [vmem:[#allocation5 + $0x348] sm:$0xff]  ;;  %v1806_v19 = vld [vmem:[#allocation5 + $0x350] sm:$0xff] }
 0x380   :  { %1481 = vst [vmem:[#allocation7 + $0x288] sm:$0xff] %v1353_v32  ;;  %v1802_v32 = vld [vmem:[#allocation2 + $0x348] sm:$0xff]  ;;  %v1825_v48 = vld [vmem:[#allocation2 + $0x3e0] sm:$0xff] }
 0x381   :  { %1482 = vst [vmem:[#allocation7 + $0x290] sm:$0xff] %v1354_v9  ;;  %v1009_v8 = vpop.permute.xlu2 %1008  ;;  %v1121_v37 = vmul.f32 %v1802_v32, %v2297_v6  ;;  %v1821_v42 = vld [vmem:[#allocation5 + $0x3c8] sm:$0xff]  ;;  %v1828_v32 = vld [vmem:[#allocation5 + $0x3f0] sm:$0xff] }
 0x382   :  { %1483 = vst [vmem:[#allocation7 + $0x298] sm:$0xff] %v1355_v31  ;;  %v1256_v30 = vmul.f32 %v1787_v10, %v1009_v8  ;;  %v1257_v18 = vmul.f32 %v1788_v13, %v1009_v8  ;;  %v1258_v56 = vmul.f32 %v1789_v41, %v1009_v8  ;;  %v1259_v33 = vmul.f32 %v1790_v27, %v1009_v8  ;;  %v1813_v13 = vld [vmem:[#allocation2 + $0x368] sm:$0xff]  ;;  %v1814_v41 = vld [vmem:[#allocation5 + $0x378] sm:$0xff] }
 0x383   :  { %1484 = vst [vmem:[#allocation7 + $0x2a0] sm:$0xff] %v1356_v55  ;;  %v1260_v62 = vmul.f32 %v1792_v14, %v1009_v8  ;;  %v1261_v11 = vmul.f32 %v1794_v20, %v1009_v8  ;;  %v1262_v29 = vmul.f32 %v1796_v34, %v1009_v8  ;;  %v1263_v45 = vmul.f32 %v1798_v44, %v1009_v8  ;;  %v1809_v55 = vld [vmem:[#allocation2 + $0x360] sm:$0xff]  ;;  %v1816_v14 = vld [vmem:[#allocation2 + $0x378] sm:$0xff]  ;;  %v1822_v44 = vld [vmem:[#allocation5 + $0x3d0] sm:$0xff] }
 0x384   :  { %1485 = vst [vmem:[#allocation7 + $0x2a8] sm:$0xff] %v1357_v22  ;;  %v1384_v38 = vadd.f32 %v1256_v30, %v1128_v60  ;;  %v1385_v3 = vadd.f32 %v1257_v18, %v1129_v12  ;;  %v1386_v40 = vadd.f32 %v1258_v56, %v1130_v2  ;;  %v1387_v51 = vadd.f32 %v1259_v33, %v1131_v7  ;;  %v1815_v33 = vld [vmem:[#allocation2 + $0x370] sm:$0xff]  ;;  %v1827_v0 = vld [vmem:[#allocation5 + $0x3e8] sm:$0xff] }
 0x385   :  { %1486 = vst [vmem:[#allocation7 + $0x2b0] sm:$0xff] %v1358_v23  ;;  %v1388_v47 = vadd.f32 %v1260_v62, %v1132_v28  ;;  %v1389_v43 = vadd.f32 %v1261_v11, %v1133_v17  ;;  %v1390_v1 = vadd.f32 %v1262_v29, %v1134_v63  ;;  %v1391_v58 = vadd.f32 %v1263_v45, %v1135_v54  ;;  %v1810_v23 = vld [vmem:[#allocation5 + $0x360] sm:$0xff]  ;;  %v1819_v28 = vld [vmem:[#allocation2 + $0x3d0] sm:$0xff]  ;;  %v1824_v63 = vld [vmem:[#allocation2 + $0x3d8] sm:$0xff] }
 0x386   :  { %1487 = vst [vmem:[#allocation7 + $0x2b8] sm:$0xff] %v1359_v4  ;;  %v1124_v22 = vmul.f32 %v1809_v55, %v2297_v6  ;;  %v1125_v18 = vmul.f32 %v1813_v13, %v2297_v6  ;;  %v1126_v50 = vmul.f32 %v1815_v33, %v2297_v6  ;;  %v1127_v62 = vmul.f32 %v1816_v14, %v2297_v6  ;;  %v1817_v11 = vld [vmem:[#allocation2 + $0x3c0] sm:$0xff] }
 0x387   :  { %1512 = vst [vmem:[#allocation7 + $0x380] sm:$0xff] %v1384_v38  ;;  %v1136_v38 = vmul.f32 %v1817_v11, %v2301_v21  ;;  %v1138_v34 = vmul.f32 %v1819_v28, %v2301_v21  ;;  %v1820_v29 = vld [vmem:[#allocation5 + $0x3c0] sm:$0xff]  ;;  %v1140_v54 = vmul.f32 %v1825_v48, %v2301_v21 }
 0x388   :  { %1513 = vst [vmem:[#allocation7 + $0x388] sm:$0xff] %v1385_v3  ;;  %v1818_v3 = vld [vmem:[#allocation2 + $0x3c8] sm:$0xff] }
 0x389   :  { %1514 = vst [vmem:[#allocation7 + $0x390] sm:$0xff] %v1386_v40  ;;  %v1003_v5 = vpop.permute.xlu1 %1002  ;;  %v1137_v49 = vmul.f32 %v1818_v3, %v2301_v21 }
 0x38a   :  { %1515 = vst [vmem:[#allocation7 + $0x398] sm:$0xff] %v1387_v51  ;;  %v1248_v9 = vmul.f32 %v1804_v39, %v1003_v5  ;;  %v1249_v15 = vmul.f32 %v1805_v36, %v1003_v5  ;;  %v1250_v31 = vmul.f32 %v1806_v19, %v1003_v5  ;;  %v1251_v52 = vmul.f32 %v1807_v61, %v1003_v5  ;;  %v1823_v51 = vld [vmem:[#allocation5 + $0x3d8] sm:$0xff]  ;;  %v1831_v19 = vld [vmem:[#allocation2 + $0x3f0] sm:$0xff] }
 0x38b   :  { %1516 = vst [vmem:[#allocation7 + $0x3a0] sm:$0xff] %v1388_v47  ;;  %v1252_v4 = vmul.f32 %v1810_v23, %v1003_v5  ;;  %v1253_v60 = vmul.f32 %v1811_v25, %v1003_v5  ;;  %v1254_v12 = vmul.f32 %v1812_v26, %v1003_v5  ;;  %v1255_v56 = vmul.f32 %v1814_v41, %v1003_v5  ;;  %v1829_v5 = vld [vmem:[#allocation2 + $0x3e8] sm:$0xff] }
 0x38c   :  { %1517 = vst [vmem:[#allocation7 + $0x3a8] sm:$0xff] %v1389_v43  ;;  %v1376_v8 = vadd.f32 %v1248_v9, %v1120_v57  ;;  %v1377_v10 = vadd.f32 %v1249_v15, %v1121_v37  ;;  %v1378_v30 = vadd.f32 %v1250_v31, %v1122_v59  ;;  %v1379_v27 = vadd.f32 %v1251_v52, %v1123_v35  ;;  %v1826_v43 = vld [vmem:[#allocation5 + $0x3e0] sm:$0xff]  ;;  %v1830_v9 = vld [vmem:[#allocation5 + $0x3f8] sm:$0xff] }
 0x38d   :  { %1518 = vst [vmem:[#allocation7 + $0x3b0] sm:$0xff] %v1390_v1  ;;  %v1380_v2 = vadd.f32 %v1252_v4, %v1124_v22  ;;  %v1381_v24 = vadd.f32 %v1253_v60, %v1125_v18  ;;  %v1382_v7 = vadd.f32 %v1254_v12, %v1126_v50  ;;  %v1383_v20 = vadd.f32 %v1255_v56, %v1127_v62  ;;  %v1832_v52 = vld [vmem:[#allocation2 + $0x3f8] sm:$0xff] }
 0x38e   :  { %1519 = vst [vmem:[#allocation7 + $0x3b8] sm:$0xff] %v1391_v58  ;;  %v1139_v47 = vmul.f32 %v1824_v63, %v2301_v21  ;;  %v1141_v39 = vmul.f32 %v1829_v5, %v2301_v21  ;;  %v1142_v31 = vmul.f32 %v1831_v19, %v2301_v21  ;;  %v1143_v16 = vmul.f32 %v1832_v52, %v2301_v21 }
 0x38f   :  { %1504 = vst [vmem:[#allocation7 + $0x340] sm:$0xff] %v1376_v8 }
 0x390   :  { %1505 = vst [vmem:[#allocation7 + $0x348] sm:$0xff] %v1377_v10 }
 0x391   :  { %1506 = vst [vmem:[#allocation7 + $0x350] sm:$0xff] %v1378_v30 }
 0x392   :  { %1507 = vst [vmem:[#allocation7 + $0x358] sm:$0xff] %v1379_v27 }
 0x393   :  { %1508 = vst [vmem:[#allocation7 + $0x360] sm:$0xff] %v1380_v2 }
 0x394   :  { %1509 = vst [vmem:[#allocation7 + $0x368] sm:$0xff] %v1381_v24 }
 0x395   :  { %1510 = vst [vmem:[#allocation7 + $0x370] sm:$0xff] %v1382_v7 }
 0x396   :  { %1511 = vst [vmem:[#allocation7 + $0x378] sm:$0xff] %v1383_v20 }
 0x399   :  { %v1015_v6 = vpop.permute.xlu1 %1014 }
 0x39a   :  { %v1264_v40 = vmul.f32 %v1820_v29, %v1015_v6  ;;  %v1265_v17 = vmul.f32 %v1821_v42, %v1015_v6  ;;  %v1266_v45 = vmul.f32 %v1822_v44, %v1015_v6  ;;  %v1267_v53 = vmul.f32 %v1823_v51, %v1015_v6 }
 0x39b   :  { %v1268_v1 = vmul.f32 %v1826_v43, %v1015_v6  ;;  %v1269_v57 = vmul.f32 %v1827_v0, %v1015_v6  ;;  %v1270_v37 = vmul.f32 %v1828_v32, %v1015_v6  ;;  %v1271_v36 = vmul.f32 %v1830_v9, %v1015_v6 }
 0x39c   :  { %v1392_v46 = vadd.f32 %v1264_v40, %v1136_v38  ;;  %v1393_v59 = vadd.f32 %v1265_v17, %v1137_v49  ;;  %v1394_v58 = vadd.f32 %v1266_v45, %v1138_v34  ;;  %v1395_v15 = vadd.f32 %v1267_v53, %v1139_v47 }
 0x39d   :  { %v1396_v61 = vadd.f32 %v1268_v1, %v1140_v54  ;;  %v1397_v35 = vadd.f32 %v1269_v57, %v1141_v39  ;;  %v1398_v55 = vadd.f32 %v1270_v37, %v1142_v31  ;;  %v1399_v22 = vadd.f32 %v1271_v36, %v1143_v16 }
 0x39e   :  { %1520 = vst [vmem:[#allocation7 + $0x3c0] sm:$0xff] %v1392_v46 }
 0x39f   :  { %1521 = vst [vmem:[#allocation7 + $0x3c8] sm:$0xff] %v1393_v59 }
 0x3a0   :  { %1522 = vst [vmem:[#allocation7 + $0x3d0] sm:$0xff] %v1394_v58 }
 0x3a1   :  { %1523 = vst [vmem:[#allocation7 + $0x3d8] sm:$0xff] %v1395_v15 }
 0x3a2   :  { %1524 = vst [vmem:[#allocation7 + $0x3e0] sm:$0xff] %v1396_v61 }
 0x3a3   :  { %1525 = vst [vmem:[#allocation7 + $0x3e8] sm:$0xff] %v1397_v35 }
 0x3a4   :  { %1526 = vst [vmem:[#allocation7 + $0x3f0] sm:$0xff] %v1398_v55 }
 0x3a5   :  { %1527 = vst [vmem:[#allocation7 + $0x3f8] sm:$0xff] %v1399_v22 }
 0x3a6   :  { %1540 = dma.vmem_to_hbm [thread:$0]  %s1533_s12, 16384, %s1535_s15, [#allocation4], %s1912_s26, %s1912_s26, %s1913_s27  }
 0x3a7   :  { %1909 = dma.done.wait [#allocation4], 16384  }
 0x3a8   :  { %1910 = vsyncadd [#allocation4], 4294950912 }
 0x3a9   :  { %1545 = vsyncpa [#allocation3], 1 }
 0x3aa   :  { %1546 = vsyncpa [#allocation6], 1 }
 0x3ab   :  { %1547 = vsyncpa [#allocation4], 1 }

</bundles_post_ra>
